<compile_context>
chip_gen: v6e
topology: v6e:2x2x1
jax: 0.10.0
libtpu: 0.0.40
codegen_flags: <defaults>
</compile_context>

<pallas_src>
import functools

import jax
import jax.numpy as jnp
import numpy as np
from jax.experimental import pallas as pl
from jax.experimental.pallas import tpu as pltpu


def _shift_src(x, d):
    """out[..., p] = x[..., (p + d) % L].

    Callers multiply by an edge-validity mask, so the wrap-around columns
    introduced by the rotation never survive (SAME zero-padding semantics).
    jnp.roll with a static shift lowers to lane slices + concatenate, which
    Mosaic executes with lane rotations (same hardware path as pltpu.roll).
    """
    return jnp.roll(x, -d, axis=-1)


# ----------------------------------------------------------------------------
# Stage 1: attention + modulation + 3x3 refine conv + BN partial sums
# ----------------------------------------------------------------------------
def _usd_stage1_kernel(x_ref, wf_ref, bf_ref, gamma_ref, beta_ref,
                       w3_ref, b3_ref, em_ref,
                       y_ref, attn_ref, sums_ref, *, img_w, num_parts):
    Bb, C, HW = x_ref.shape
    NP = wf_ref.shape[0] // 2          # part dim padded to a sublane multiple
    N = num_parts
    W = img_w

    # ---- constants, hoisted out of the per-sample loop ----
    wf = wf_ref[...]                   # (2*NP, C) fused 1x1-conv + prototype weights
    bf = bf_ref[...]                   # (N, 1)
    gamma = gamma_ref[...]             # (C, 1)
    beta = beta_ref[...]               # (C, 1)
    b3 = b3_ref[...]                   # (C, 1)
    em = em_ref[...]                   # (4, HW) edge-validity masks (0/1 f32)
    w_ge1, w_le, h_ge1, h_le = em[0:1], em[1:2], em[2:3], em[3:4]
    cdt = w3_ref.dtype                 # f32, or bf16 when use_bf16_mxu
    w3_0, w3_1, w3_2 = w3_ref[0], w3_ref[1], w3_ref[2]   # (3C, C) per kw tap

    mm = functools.partial(jnp.dot, preferred_element_type=jnp.float32)

    sum_y = jnp.zeros((C, 1), jnp.float32)
    sum_y2 = jnp.zeros((C, 1), jnp.float32)

    # Static unroll over the samples of this batch block (wrapper keeps Bb<=8
    # so unrolled code size / live ranges stay bounded).
    for i in range(Bb):
        x = x_ref[i]                                             # (C, HW)

        # fused 1x1-conv + cosine-prototype logits: one (2*NP, C)@(C, HW) matmul
        lg = mm(wf, x)                                           # (2*NP, HW)
        ssq = jnp.sum(x * x, axis=0, keepdims=True)              # (1, HW)
        inv_norm = jax.lax.rsqrt(jnp.maximum(ssq, 1e-24))        # 1/max(||x||,1e-12)
        logits = lg[0:N] + bf + inv_norm * lg[NP:NP + N]         # (N, HW)

        # softmax over parts; selected_attention == max(softmax) == 1/denominator
        mx = jnp.max(logits, axis=0, keepdims=True)
        e = jnp.exp(logits - mx)
        inv_l = pl.reciprocal(jnp.sum(e, axis=0, keepdims=True), approx=True)
        attn = e * inv_l                                         # (N, HW)
        selected = inv_l                                         # (1, HW)

        # feature modulation (lane-dense elementwise)
        mod = x * (1.0 + selected * gamma) + beta                # (C, HW)

        # 3x3 SAME conv: W shifts (lane rotation + edge mask), fused channel
        # mixing (three accumulating K=C matmuls, one per kw tap), H shifts.
        mod_l = _shift_src(mod, -1) * w_ge1          # value at pixel (h, w-1)
        mod_r = _shift_src(mod, +1) * w_le           # value at pixel (h, w+1)
        t = (mm(w3_0, mod_l.astype(cdt))
             + mm(w3_1, mod.astype(cdt))
             + mm(w3_2, mod_r.astype(cdt)))          # (3C, HW), rows (kh, co)
        y = (t[C:2 * C] + b3
             + _shift_src(t[0:C], -W) * h_ge1        # kh=0 tap -> row h-1
             + _shift_src(t[2 * C:], +W) * h_le)     # kh=2 tap -> row h+1

        y_ref[i] = y
        attn_ref[i] = attn
        sum_y = sum_y + jnp.sum(y, axis=1, keepdims=True)
        sum_y2 = sum_y2 + jnp.sum(y * y, axis=1, keepdims=True)

    # Per-block single-pass BN partial sums (finalized on the host side).
    # TODO(synk): a lane-dense / SMEM emission of these 2*C scalars would
    # avoid one masked vst per step (minor).
    sums_ref[0] = jnp.concatenate([sum_y, sum_y2], axis=1)       # (C, 2)


# ----------------------------------------------------------------------------
# Stage 2: BatchNorm (batch statistics) finalize + ReLU, in-place on y
# ----------------------------------------------------------------------------
def _bn_relu_kernel(y_ref, scale_ref, shift_ref, out_ref):
    out_ref[...] = jnp.maximum(y_ref[...] * scale_ref[...] + shift_ref[...], 0.0)


def _const_spec(a):
    nd = a.ndim
    return pl.BlockSpec(a.shape, lambda b, nd=nd: (0,) * nd)


def _pick_block(batch, per_sample_bytes, target_bytes, cap):
    """Largest divisor of `batch` with block <= target bytes and <= cap."""
    bb = max(1, min(batch, cap, target_bytes // max(per_sample_bytes, 1)))
    while batch % bb:
        bb -= 1
    return bb


def unsupervised_semantic_discovery(features_nchw, params, *,
                                    use_bf16_mxu=False,
                                    block_bytes=2 * 1024 * 1024):
    """features_nchw: (B, C, H, W) f32.  Returns (enhanced NCHW, attention (B,N,H,W))."""
    B, C, H, W = features_nchw.shape
    HW = H * W
    N = params["prototypes"].shape[0]
    NP = ((N + 7) // 8) * 8            # pad part dim so both logit blocks are sublane-aligned
    f32 = jnp.float32

    # TODO(synk): if production H*W is not a multiple of 128, pad the pixel
    # axis here (and mask the pad columns in the softmax / BN sums) so every
    # store stays lane-dense.
    x = features_nchw.reshape(B, C, HW).astype(f32)   # free reshape of contiguous NCHW

    # ---- hoisted, data-independent parameter preprocessing ----
    cw = jax.nn.softmax(params["combine_w"].astype(f32))
    wa = params["attn_w"].reshape(N, C).astype(f32)
    protos = params["prototypes"].astype(f32)
    pn = protos / jnp.maximum(jnp.linalg.norm(protos, axis=1, keepdims=True), 1e-12)
    wf = jnp.zeros((2 * NP, C), f32)
    wf = wf.at[0:N].set(cw[0] * wa)                   # 1x1-conv weights, combine weight folded in
    wf = wf.at[NP:NP + N].set(cw[1] * pn)             # normalized prototypes, combine weight folded in
    bf = (cw[0] * params["attn_b"].astype(f32)).reshape(N, 1)
    gamma = params["gamma"].reshape(C, 1).astype(f32)
    beta = params["beta"].reshape(C, 1).astype(f32)
    # PyTorch conv weight (Cout, Cin, 3, 3) -> per-kw (3*Cout, Cin) blocks, rows (kh, Cout).
    conv_dt = jnp.bfloat16 if use_bf16_mxu else f32   # bf16 operands = v6e/v7x full-rate MXU
    w3t = jnp.transpose(params["ref_w"].astype(f32), (2, 0, 1, 3))   # (kh, co, ci, kw)
    w3 = jnp.stack([w3t[..., k].reshape(3 * C, C) for k in range(3)],
                   axis=0).astype(conv_dt)                            # (3, 3C, C)
    b3 = params["ref_b"].reshape(C, 1).astype(f32)

    # ---- edge-validity masks for the SAME-padded 3x3 conv (1 = neighbour in range) ----
    p = np.arange(HW)
    wq, hq = p % W, p // W
    em = jnp.asarray(np.stack([(wq >= 1), (wq <= W - 2),
                               (hq >= 1), (hq <= H - 2)]).astype(np.float32))  # (4, HW)

    # ---- stage 1: Bb samples per grid step, batch-parallel grid ----
    # TODO(synk): on v7x, if B // bb is 1 (or odd) add a second "parallel"
    # grid axis over pixel row-blocks (with a 1-row halo) so both TCs get work.
    bb = _pick_block(B, (2 * C + N) * HW * 4, block_bytes, cap=8)
    nblk = B // bb
    kern = functools.partial(_usd_stage1_kernel, img_w=W, num_parts=N)
    y_pre, attn_flat, sums = pl.pallas_call(
        kern,
        grid=(nblk,),
        in_specs=[pl.BlockSpec((bb, C, HW), lambda b: (b, 0, 0)),
                  _const_spec(wf), _const_spec(bf), _const_spec(gamma),
                  _const_spec(beta), _const_spec(w3), _const_spec(b3),
                  _const_spec(em)],
        out_specs=(pl.BlockSpec((bb, C, HW), lambda b: (b, 0, 0)),
                   pl.BlockSpec((bb, N, HW), lambda b: (b, 0, 0)),
                   pl.BlockSpec((1, C, 2), lambda b: (b, 0, 0))),
        out_shape=(jax.ShapeDtypeStruct((B, C, HW), f32),
                   jax.ShapeDtypeStruct((B, N, HW), f32),
                   jax.ShapeDtypeStruct((nblk, C, 2), f32)),
        compiler_params=pltpu.CompilerParams(
            dimension_semantics=("parallel",),
            vmem_limit_bytes=32 * 1024 * 1024),
    )(x, wf, bf, gamma, beta, w3, b3, em)

    # ---- BN finalize: fold batch statistics into per-channel scale/shift ----
    # TODO(synk): single-pass E[y^2]-E[y]^2 cancels badly when |mean| >> std;
    # switch to a centered second pass for production feature statistics.
    cnt = float(B * HW)
    tot = jnp.sum(sums, axis=0)                       # (C, 2)
    mean = tot[:, 0] / cnt
    var = jnp.maximum(tot[:, 1] / cnt - mean * mean, 0.0)
    inv_std = jax.lax.rsqrt(var + 1e-5)
    scale = (params["bn_w"].astype(f32) * inv_std).reshape(C, 1)
    shift = (params["bn_b"].astype(f32) - mean * scale[:, 0]).reshape(C, 1)

    # ---- stage 2: BN + ReLU, whole-batch lane-dense slabs, in-place on y ----
    bb2 = _pick_block(B, C * HW * 4, 2 * block_bytes, cap=B)
    out_flat = pl.pallas_call(
        _bn_relu_kernel,
        grid=(B // bb2,),
        in_specs=[pl.BlockSpec((bb2, C, HW), lambda b: (b, 0, 0)),
                  _const_spec(scale), _const_spec(shift)],
        out_specs=pl.BlockSpec((bb2, C, HW), lambda b: (b, 0, 0)),
        out_shape=jax.ShapeDtypeStruct((B, C, HW), f32),
        input_output_aliases={0: 0},
        compiler_params=pltpu.CompilerParams(
            dimension_semantics=("parallel",),
            vmem_limit_bytes=32 * 1024 * 1024),
    )(y_pre, scale, shift)

    enhanced = out_flat.reshape(B, C, H, W)
    part_attention = attn_flat.reshape(B, N, H, W)
    return enhanced, part_attention


def _reference(features, params):
    """Pure-JAX reference mirroring the PyTorch forward (training-mode BN)."""
    B, C, H, W = features.shape
    N = params["prototypes"].shape[0]
    hp = jax.lax.Precision.HIGHEST
    w = params["attn_w"].reshape(N, C)
    conv_logits = jnp.einsum('bchw,nc->bnhw', features, w, precision=hp)
    conv_logits = conv_logits + params["attn_b"].reshape(1, N, 1, 1)
    ff = features.reshape(B, C, H * W)
    fn = ff / jnp.maximum(jnp.linalg.norm(ff, axis=1, keepdims=True), 1e-12)
    pn = params["prototypes"] / jnp.maximum(
        jnp.linalg.norm(params["prototypes"], axis=1, keepdims=True), 1e-12)
    proto_logits = jnp.einsum('bch,nc->bnh', fn, pn, precision=hp).reshape(B, N, H, W)
    cw = jax.nn.softmax(params["combine_w"])
    part_logits = cw[0] * conv_logits + cw[1] * proto_logits
    attn = jax.nn.softmax(part_logits, axis=1)
    sel = jnp.max(attn, axis=1, keepdims=True)
    mod = features * (1.0 + sel * params["gamma"]) + params["beta"]
    y = jax.lax.conv_general_dilated(mod, params["ref_w"], (1, 1), 'SAME',
                                     dimension_numbers=('NCHW', 'OIHW', 'NCHW'),
                                     precision=hp)
    y = y + params["ref_b"].reshape(1, C, 1, 1)
    mean = jnp.mean(y, axis=(0, 2, 3), keepdims=True)
    var = jnp.mean((y - mean) ** 2, axis=(0, 2, 3), keepdims=True)
    y_bn = (y - mean) / jnp.sqrt(var + 1e-5) * params["bn_w"].reshape(1, C, 1, 1) \
        + params["bn_b"].reshape(1, C, 1, 1)
    return jnp.maximum(y_bn, 0.0), attn


if __name__ == "__main__":
    B, C, H, W, N = 2, 32, 16, 16, 6     # small shapes (in_channels=32, num_parts=6)
    key = jax.random.PRNGKey(0)
    ks = jax.random.split(key, 6)

    features = jax.random.normal(ks[0], (B, C, H, W), jnp.float32)

    # Deterministic parameter init (shapes follow the module's __init__).
    params = {
        "prototypes": jax.random.normal(ks[1], (N, C), jnp.float32),          # part_prototypes
        "attn_w": jax.random.normal(ks[2], (N, C, 1, 1), jnp.float32) * 0.1,  # part_attention conv
        "attn_b": jax.random.normal(ks[3], (N,), jnp.float32) * 0.1,
        "combine_w": jnp.array([0.5, 0.5], jnp.float32),                      # alpha_proto=0.5
        "gamma": jnp.ones((1, C, 1, 1), jnp.float32),
        "beta": jnp.zeros((1, C, 1, 1), jnp.float32),
        "ref_w": jax.random.normal(ks[4], (C, C, 3, 3), jnp.float32) * 0.05,  # refinement conv
        "ref_b": jax.random.normal(ks[5], (C,), jnp.float32) * 0.05,
        "bn_w": jnp.ones((C,), jnp.float32),                                  # BatchNorm affine
        "bn_b": jnp.zeros((C,), jnp.float32),
    }

    fwd = jax.jit(unsupervised_semantic_discovery)
    enhanced, attn = fwd(features, params)
    jax.block_until_ready((enhanced, attn))

    ref_enh, ref_attn = _reference(features, params)
    assert jnp.allclose(attn, ref_attn, atol=2e-3, rtol=2e-3)
    assert jnp.allclose(enhanced, ref_enh, atol=2e-2, rtol=2e-2)

    print("KERNEL_OK")
</pallas_src>

<mosaic_0001>
module attributes {stable_mosaic.version = 11 : i64} {
  func.func @_bn_relu_kernel(%arg0: i32, %arg1: memref<2x32x256xf32, #tpu.memory_space<vmem>>, %arg2: memref<32x1xf32, #tpu.memory_space<vmem>>, %arg3: memref<32x1xf32, #tpu.memory_space<vmem>>, %arg4: memref<2x32x256xf32, #tpu.memory_space<vmem>>) attributes {dimension_semantics = [#tpu.dimension_semantics<parallel>], iteration_bounds = array<i64: 1>, scalar_prefetch = 0 : i64, scratch_operands = 0 : i64, tpu.core_type = #tpu.core_type<tc>, window_params = [{transform_indices = @transform_0, window_bounds = array<i64: 2, 32, 256>}, {pipeline_mode = #tpu.pipeline_mode<synchronous>, transform_indices = @transform_1, window_bounds = array<i64: 32, 1>}, {pipeline_mode = #tpu.pipeline_mode<synchronous>, transform_indices = @transform_2, window_bounds = array<i64: 32, 1>}, {transform_indices = @transform_3, window_bounds = array<i64: 2, 32, 256>}]} {
    %c0 = arith.constant 0 : index
    %c0_0 = arith.constant 0 : index
    %c0_1 = arith.constant 0 : index
    %0 = vector.load %arg1[%c0, %c0_0, %c0_1] : memref<2x32x256xf32, #tpu.memory_space<vmem>>, vector<2x32x256xf32>
    %c0_2 = arith.constant 0 : index
    %c0_3 = arith.constant 0 : index
    %1 = vector.load %arg2[%c0_2, %c0_3] : memref<32x1xf32, #tpu.memory_space<vmem>>, vector<32x1xf32>
    %2 = vector.shape_cast %1 : vector<32x1xf32> to vector<1x32x1xf32>
    %3 = vector.broadcast %2 : vector<1x32x1xf32> to vector<2x32x256xf32>
    %4 = arith.mulf %0, %3 : vector<2x32x256xf32>
    %c0_4 = arith.constant 0 : index
    %c0_5 = arith.constant 0 : index
    %5 = vector.load %arg3[%c0_4, %c0_5] : memref<32x1xf32, #tpu.memory_space<vmem>>, vector<32x1xf32>
    %6 = vector.shape_cast %5 : vector<32x1xf32> to vector<1x32x1xf32>
    %7 = vector.broadcast %6 : vector<1x32x1xf32> to vector<2x32x256xf32>
    %8 = arith.addf %4, %7 : vector<2x32x256xf32>
    %cst = arith.constant 0.000000e+00 : f32
    %9 = vector.broadcast %cst : f32 to vector<2x32x256xf32>
    %10 = arith.maximumf %8, %9 : vector<2x32x256xf32>
    %c0_6 = arith.constant 0 : index
    %c0_7 = arith.constant 0 : index
    %c0_8 = arith.constant 0 : index
    %11 = vector.load %arg4[%c0_6, %c0_7, %c0_8] : memref<2x32x256xf32, #tpu.memory_space<vmem>>, vector<2x32x256xf32>
    tpu.vector_store %arg4[%c0_6, %c0_7, %c0_8], %10 {strides = array<i32>} : memref<2x32x256xf32, #tpu.memory_space<vmem>>, vector<2x32x256xf32>,
    return
  }
  func.func @transform_0(%arg0: i32) -> (i32, i32, i32) {
    %c0_i32 = arith.constant 0 : i32
    %c0_i32_0 = arith.constant 0 : i32
    %c0_i32_1 = arith.constant 0 : i32
    return %arg0, %c0_i32, %c0_i32_0 : i32, i32, i32
  }
  func.func @transform_1(%arg0: i32) -> (i32, i32) {
    %c0_i32 = arith.constant 0 : i32
    %c0_i32_0 = arith.constant 0 : i32
    %c0_i32_1 = arith.constant 0 : i32
    return %c0_i32, %c0_i32_0 : i32, i32
  }
  func.func @transform_2(%arg0: i32) -> (i32, i32) {
    %c0_i32 = arith.constant 0 : i32
    %c0_i32_0 = arith.constant 0 : i32
    %c0_i32_1 = arith.constant 0 : i32
    return %c0_i32, %c0_i32_0 : i32, i32
  }
  func.func @transform_3(%arg0: i32) -> (i32, i32, i32) {
    %c0_i32 = arith.constant 0 : i32
    %c0_i32_0 = arith.constant 0 : i32
    %c0_i32_1 = arith.constant 0 : i32
    return %arg0, %c0_i32, %c0_i32_0 : i32, i32, i32
  }
}

module attributes {stable_mosaic.version = 11 : i64} {
  func.func @_usd_stage1_kernel(%arg0: i32, %arg1: memref<2x32x256xf32, #tpu.memory_space<vmem>>, %arg2: memref<16x32xf32, #tpu.memory_space<vmem>>, %arg3: memref<6x1xf32, #tpu.memory_space<vmem>>, %arg4: memref<32x1xf32, #tpu.memory_space<vmem>>, %arg5: memref<32x1xf32, #tpu.memory_space<vmem>>, %arg6: memref<3x96x32xf32, #tpu.memory_space<vmem>>, %arg7: memref<32x1xf32, #tpu.memory_space<vmem>>, %arg8: memref<4x256xf32, #tpu.memory_space<vmem>>, %arg9: memref<2x32x256xf32, #tpu.memory_space<vmem>>, %arg10: memref<2x6x256xf32, #tpu.memory_space<vmem>>, %arg11: memref<1x32x2xf32, #tpu.memory_space<vmem>>) attributes {dimension_semantics = [#tpu.dimension_semantics<parallel>], iteration_bounds = array<i64: 1>, scalar_prefetch = 0 : i64, scratch_operands = 0 : i64, tpu.core_type = #tpu.core_type<tc>, window_params = [{transform_indices = @transform_0, window_bounds = array<i64: 2, 32, 256>}, {pipeline_mode = #tpu.pipeline_mode<synchronous>, transform_indices = @transform_1, window_bounds = array<i64: 16, 32>}, {pipeline_mode = #tpu.pipeline_mode<synchronous>, transform_indices = @transform_2, window_bounds = array<i64: 6, 1>}, {pipeline_mode = #tpu.pipeline_mode<synchronous>, transform_indices = @transform_3, window_bounds = array<i64: 32, 1>}, {pipeline_mode = #tpu.pipeline_mode<synchronous>, transform_indices = @transform_4, window_bounds = array<i64: 32, 1>}, {pipeline_mode = #tpu.pipeline_mode<synchronous>, transform_indices = @transform_5, window_bounds = array<i64: 3, 96, 32>}, {pipeline_mode = #tpu.pipeline_mode<synchronous>, transform_indices = @transform_6, window_bounds = array<i64: 32, 1>}, {pipeline_mode = #tpu.pipeline_mode<synchronous>, transform_indices = @transform_7, window_bounds = array<i64: 4, 256>}, {transform_indices = @transform_8, window_bounds = array<i64: 2, 32, 256>}, {transform_indices = @transform_9, window_bounds = array<i64: 2, 6, 256>}, {transform_indices = @transform_10, window_bounds = array<i64: 1, 32, 2>}]} {
    %c0 = arith.constant 0 : index
    %c0_0 = arith.constant 0 : index
    %0 = vector.load %arg2[%c0, %c0_0] : memref<16x32xf32, #tpu.memory_space<vmem>>, vector<16x32xf32>
    %c0_1 = arith.constant 0 : index
    %c0_2 = arith.constant 0 : index
    %1 = vector.load %arg3[%c0_1, %c0_2] : memref<6x1xf32, #tpu.memory_space<vmem>>, vector<6x1xf32>
    %c0_3 = arith.constant 0 : index
    %c0_4 = arith.constant 0 : index
    %2 = vector.load %arg4[%c0_3, %c0_4] : memref<32x1xf32, #tpu.memory_space<vmem>>, vector<32x1xf32>
    %c0_5 = arith.constant 0 : index
    %c0_6 = arith.constant 0 : index
    %3 = vector.load %arg5[%c0_5, %c0_6] : memref<32x1xf32, #tpu.memory_space<vmem>>, vector<32x1xf32>
    %c0_7 = arith.constant 0 : index
    %c0_8 = arith.constant 0 : index
    %4 = vector.load %arg7[%c0_7, %c0_8] : memref<32x1xf32, #tpu.memory_space<vmem>>, vector<32x1xf32>
    %c0_9 = arith.constant 0 : index
    %c0_10 = arith.constant 0 : index
    %5 = vector.load %arg8[%c0_9, %c0_10] : memref<4x256xf32, #tpu.memory_space<vmem>>, vector<4x256xf32>
    %6 = vector.extract_strided_slice %5 {offsets = [0, 0], sizes = [1, 256], strides = [1, 1]} : vector<4x256xf32> to vector<1x256xf32>
    %7 = vector.extract_strided_slice %5 {offsets = [1, 0], sizes = [1, 256], strides = [1, 1]} : vector<4x256xf32> to vector<1x256xf32>
    %8 = vector.extract_strided_slice %5 {offsets = [2, 0], sizes = [1, 256], strides = [1, 1]} : vector<4x256xf32> to vector<1x256xf32>
    %9 = vector.extract_strided_slice %5 {offsets = [3, 0], sizes = [1, 256], strides = [1, 1]} : vector<4x256xf32> to vector<1x256xf32>
    %c0_11 = arith.constant 0 : index
    %c0_12 = arith.constant 0 : index
    %c0_13 = arith.constant 0 : index
    %10 = vector.load %arg6[%c0_11, %c0_12, %c0_13] : memref<3x96x32xf32, #tpu.memory_space<vmem>>, vector<1x96x32xf32>
    %11 = vector.shape_cast %10 : vector<1x96x32xf32> to vector<96x32xf32>
    %c1 = arith.constant 1 : index
    %c0_14 = arith.constant 0 : index
    %c0_15 = arith.constant 0 : index
    %12 = vector.load %arg6[%c1, %c0_14, %c0_15] : memref<3x96x32xf32, #tpu.memory_space<vmem>>, vector<1x96x32xf32>
    %13 = vector.shape_cast %12 : vector<1x96x32xf32> to vector<96x32xf32>
    %c2 = arith.constant 2 : index
    %c0_16 = arith.constant 0 : index
    %c0_17 = arith.constant 0 : index
    %14 = vector.load %arg6[%c2, %c0_16, %c0_17] : memref<3x96x32xf32, #tpu.memory_space<vmem>>, vector<1x96x32xf32>
    %15 = vector.shape_cast %14 : vector<1x96x32xf32> to vector<96x32xf32>
    %cst = arith.constant 0.000000e+00 : f32
    %16 = vector.broadcast %cst : f32 to vector<32x1xf32>
    %cst_18 = arith.constant 0.000000e+00 : f32
    %17 = vector.broadcast %cst_18 : f32 to vector<32x1xf32>
    %c0_19 = arith.constant 0 : index
    %c0_20 = arith.constant 0 : index
    %c0_21 = arith.constant 0 : index
    %18 = vector.load %arg1[%c0_19, %c0_20, %c0_21] : memref<2x32x256xf32, #tpu.memory_space<vmem>>, vector<1x32x256xf32>
    %19 = vector.shape_cast %18 : vector<1x32x256xf32> to vector<32x256xf32>
    %cst_22 = arith.constant dense<0.000000e+00> : vector<16x256xf32>
    %20 = tpu.matmul %0, %19, %cst_22 {dimension_numbers = #tpu.dot_dimension_numbers<[1], [0], [0], [1], [0, 0, 1, 1], [], []>} : vector<16x32xf32>, vector<32x256xf32>, vector<16x256xf32> -> vector<16x256xf32>
    %21 = arith.mulf %19, %19 : vector<32x256xf32>
    %cst_23 = arith.constant dense<0.000000e+00> : vector<256xf32>
    %22 = vector.multi_reduction <add>, %21, %cst_23 [0] : vector<32x256xf32> to vector<256xf32>
    %23 = vector.shape_cast %22 : vector<256xf32> to vector<1x256xf32>
    %cst_24 = arith.constant 1.000000e-24 : f32
    %24 = vector.broadcast %cst_24 : f32 to vector<1x256xf32>
    %25 = arith.maximumf %23, %24 : vector<1x256xf32>
    %26 = math.rsqrt %25 : vector<1x256xf32>
    %27 = vector.extract_strided_slice %20 {offsets = [0, 0], sizes = [6, 256], strides = [1, 1]} : vector<16x256xf32> to vector<6x256xf32>
    %28 = vector.broadcast %1 : vector<6x1xf32> to vector<6x256xf32>
    %29 = arith.addf %27, %28 : vector<6x256xf32>
    %30 = vector.extract_strided_slice %20 {offsets = [8, 0], sizes = [6, 256], strides = [1, 1]} : vector<16x256xf32> to vector<6x256xf32>
    %31 = vector.broadcast %26 : vector<1x256xf32> to vector<6x256xf32>
    %32 = arith.mulf %31, %30 : vector<6x256xf32>
    %33 = arith.addf %29, %32 : vector<6x256xf32>
    %cst_25 = arith.constant dense<0xFF800000> : vector<256xf32>
    %34 = vector.multi_reduction <maximumf>, %33, %cst_25 [0] : vector<6x256xf32> to vector<256xf32>
    %35 = vector.shape_cast %34 : vector<256xf32> to vector<1x256xf32>
    %36 = vector.broadcast %35 : vector<1x256xf32> to vector<6x256xf32>
    %37 = arith.subf %33, %36 : vector<6x256xf32>
    %38 = math.exp %37 : vector<6x256xf32>
    %cst_26 = arith.constant dense<0.000000e+00> : vector<256xf32>
    %39 = vector.multi_reduction <add>, %38, %cst_26 [0] : vector<6x256xf32> to vector<256xf32>
    %40 = vector.shape_cast %39 : vector<256xf32> to vector<1x256xf32>
    %41 = tpu.reciprocal %40 {approx = true} : vector<1x256xf32> -> vector<1x256xf32>
    %42 = vector.broadcast %41 : vector<1x256xf32> to vector<6x256xf32>
    %43 = arith.mulf %38, %42 : vector<6x256xf32>
    %44 = vector.broadcast %41 : vector<1x256xf32> to vector<32x256xf32>
    %45 = vector.broadcast %2 : vector<32x1xf32> to vector<32x256xf32>
    %46 = arith.mulf %44, %45 : vector<32x256xf32>
    %cst_27 = arith.constant 1.000000e+00 : f32
    %47 = vector.broadcast %cst_27 : f32 to vector<32x256xf32>
    %48 = arith.addf %47, %46 : vector<32x256xf32>
    %49 = arith.mulf %19, %48 : vector<32x256xf32>
    %50 = vector.broadcast %3 : vector<32x1xf32> to vector<32x256xf32>
    %51 = arith.addf %49, %50 : vector<32x256xf32>
    %52 = vector.extract_strided_slice %51 {offsets = [0, 255], sizes = [32, 1], strides = [1, 1]} : vector<32x256xf32> to vector<32x1xf32>
    %53 = vector.extract_strided_slice %51 {offsets = [0, 0], sizes = [32, 255], strides = [1, 1]} : vector<32x256xf32> to vector<32x255xf32>
    %54 = tpu.concatenate %52, %53 in 1 : vector<32x1xf32>, vector<32x255xf32> -> vector<32x256xf32>
    %55 = vector.broadcast %6 : vector<1x256xf32> to vector<32x256xf32>
    %56 = arith.mulf %54, %55 : vector<32x256xf32>
    %57 = vector.extract_strided_slice %51 {offsets = [0, 1], sizes = [32, 255], strides = [1, 1]} : vector<32x256xf32> to vector<32x255xf32>
    %58 = vector.extract_strided_slice %51 {offsets = [0, 0], sizes = [32, 1], strides = [1, 1]} : vector<32x256xf32> to vector<32x1xf32>
    %59 = tpu.concatenate %57, %58 in 1 : vector<32x255xf32>, vector<32x1xf32> -> vector<32x256xf32>
    %60 = vector.broadcast %7 : vector<1x256xf32> to vector<32x256xf32>
    %61 = arith.mulf %59, %60 : vector<32x256xf32>
    %cst_28 = arith.constant dense<0.000000e+00> : vector<96x256xf32>
    %62 = tpu.matmul %11, %56, %cst_28 {dimension_numbers = #tpu.dot_dimension_numbers<[1], [0], [0], [1], [0, 0, 1, 1], [], []>} : vector<96x32xf32>, vector<32x256xf32>, vector<96x256xf32> -> vector<96x256xf32>
    %cst_29 = arith.constant dense<0.000000e+00> : vector<96x256xf32>
    %63 = tpu.matmul %13, %51, %cst_29 {dimension_numbers = #tpu.dot_dimension_numbers<[1], [0], [0], [1], [0, 0, 1, 1], [], []>} : vector<96x32xf32>, vector<32x256xf32>, vector<96x256xf32> -> vector<96x256xf32>
    %64 = arith.addf %62, %63 : vector<96x256xf32>
    %cst_30 = arith.constant dense<0.000000e+00> : vector<96x256xf32>
    %65 = tpu.matmul %15, %61, %cst_30 {dimension_numbers = #tpu.dot_dimension_numbers<[1], [0], [0], [1], [0, 0, 1, 1], [], []>} : vector<96x32xf32>, vector<32x256xf32>, vector<96x256xf32> -> vector<96x256xf32>
    %66 = arith.addf %64, %65 : vector<96x256xf32>
    %67 = vector.extract_strided_slice %66 {offsets = [32, 0], sizes = [32, 256], strides = [1, 1]} : vector<96x256xf32> to vector<32x256xf32>
    %68 = vector.broadcast %4 : vector<32x1xf32> to vector<32x256xf32>
    %69 = arith.addf %67, %68 : vector<32x256xf32>
    %70 = vector.extract_strided_slice %66 {offsets = [0, 0], sizes = [32, 256], strides = [1, 1]} : vector<96x256xf32> to vector<32x256xf32>
    %71 = vector.extract_strided_slice %70 {offsets = [0, 240], sizes = [32, 16], strides = [1, 1]} : vector<32x256xf32> to vector<32x16xf32>
    %72 = vector.extract_strided_slice %70 {offsets = [0, 0], sizes = [32, 240], strides = [1, 1]} : vector<32x256xf32> to vector<32x240xf32>
    %73 = tpu.concatenate %71, %72 in 1 : vector<32x16xf32>, vector<32x240xf32> -> vector<32x256xf32>
    %74 = vector.broadcast %8 : vector<1x256xf32> to vector<32x256xf32>
    %75 = arith.mulf %73, %74 : vector<32x256xf32>
    %76 = arith.addf %69, %75 : vector<32x256xf32>
    %77 = vector.extract_strided_slice %66 {offsets = [64, 0], sizes = [32, 256], strides = [1, 1]} : vector<96x256xf32> to vector<32x256xf32>
    %78 = vector.extract_strided_slice %77 {offsets = [0, 16], sizes = [32, 240], strides = [1, 1]} : vector<32x256xf32> to vector<32x240xf32>
    %79 = vector.extract_strided_slice %77 {offsets = [0, 0], sizes = [32, 16], strides = [1, 1]} : vector<32x256xf32> to vector<32x16xf32>
    %80 = tpu.concatenate %78, %79 in 1 : vector<32x240xf32>, vector<32x16xf32> -> vector<32x256xf32>
    %81 = vector.broadcast %9 : vector<1x256xf32> to vector<32x256xf32>
    %82 = arith.mulf %80, %81 : vector<32x256xf32>
    %83 = arith.addf %76, %82 : vector<32x256xf32>
    %c0_31 = arith.constant 0 : index
    %c0_32 = arith.constant 0 : index
    %c0_33 = arith.constant 0 : index
    %84 = vector.load %arg9[%c0_31, %c0_32, %c0_33] : memref<2x32x256xf32, #tpu.memory_space<vmem>>, vector<1x32x256xf32>
    %85 = vector.shape_cast %84 : vector<1x32x256xf32> to vector<32x256xf32>
    %86 = vector.shape_cast %83 : vector<32x256xf32> to vector<1x32x256xf32>
    tpu.vector_store %arg9[%c0_31, %c0_32, %c0_33], %86 {strides = array<i32>} : memref<2x32x256xf32, #tpu.memory_space<vmem>>, vector<1x32x256xf32>,
    %c0_34 = arith.constant 0 : index
    %c0_35 = arith.constant 0 : index
    %c0_36 = arith.constant 0 : index
    %87 = vector.load %arg10[%c0_34, %c0_35, %c0_36] : memref<2x6x256xf32, #tpu.memory_space<vmem>>, vector<1x6x256xf32>
    %88 = vector.shape_cast %87 : vector<1x6x256xf32> to vector<6x256xf32>
    %89 = vector.shape_cast %43 : vector<6x256xf32> to vector<1x6x256xf32>
    tpu.vector_store %arg10[%c0_34, %c0_35, %c0_36], %89 {strides = array<i32>} : memref<2x6x256xf32, #tpu.memory_space<vmem>>, vector<1x6x256xf32>,
    %cst_37 = arith.constant dense<0.000000e+00> : vector<32xf32>
    %90 = vector.multi_reduction <add>, %83, %cst_37 [1] : vector<32x256xf32> to vector<32xf32>
    %91 = vector.shape_cast %90 : vector<32xf32> to vector<32x1xf32>
    %92 = arith.addf %16, %91 : vector<32x1xf32>
    %93 = arith.mulf %83, %83 : vector<32x256xf32>
    %cst_38 = arith.constant dense<0.000000e+00> : vector<32xf32>
    %94 = vector.multi_reduction <add>, %93, %cst_38 [1] : vector<32x256xf32> to vector<32xf32>
    %95 = vector.shape_cast %94 : vector<32xf32> to vector<32x1xf32>
    %96 = arith.addf %17, %95 : vector<32x1xf32>
    %c1_39 = arith.constant 1 : index
    %c0_40 = arith.constant 0 : index
    %c0_41 = arith.constant 0 : index
    %97 = vector.load %arg1[%c1_39, %c0_40, %c0_41] : memref<2x32x256xf32, #tpu.memory_space<vmem>>, vector<1x32x256xf32>
    %98 = vector.shape_cast %97 : vector<1x32x256xf32> to vector<32x256xf32>
    %cst_42 = arith.constant dense<0.000000e+00> : vector<16x256xf32>
    %99 = tpu.matmul %0, %98, %cst_42 {dimension_numbers = #tpu.dot_dimension_numbers<[1], [0], [0], [1], [0, 0, 1, 1], [], []>} : vector<16x32xf32>, vector<32x256xf32>, vector<16x256xf32> -> vector<16x256xf32>
    %100 = arith.mulf %98, %98 : vector<32x256xf32>
    %cst_43 = arith.constant dense<0.000000e+00> : vector<256xf32>
    %101 = vector.multi_reduction <add>, %100, %cst_43 [0] : vector<32x256xf32> to vector<256xf32>
    %102 = vector.shape_cast %101 : vector<256xf32> to vector<1x256xf32>
    %cst_44 = arith.constant 1.000000e-24 : f32
    %103 = vector.broadcast %cst_44 : f32 to vector<1x256xf32>
    %104 = arith.maximumf %102, %103 : vector<1x256xf32>
    %105 = math.rsqrt %104 : vector<1x256xf32>
    %106 = vector.extract_strided_slice %99 {offsets = [0, 0], sizes = [6, 256], strides = [1, 1]} : vector<16x256xf32> to vector<6x256xf32>
    %107 = vector.broadcast %1 : vector<6x1xf32> to vector<6x256xf32>
    %108 = arith.addf %106, %107 : vector<6x256xf32>
    %109 = vector.extract_strided_slice %99 {offsets = [8, 0], sizes = [6, 256], strides = [1, 1]} : vector<16x256xf32> to vector<6x256xf32>
    %110 = vector.broadcast %105 : vector<1x256xf32> to vector<6x256xf32>
    %111 = arith.mulf %110, %109 : vector<6x256xf32>
    %112 = arith.addf %108, %111 : vector<6x256xf32>
    %cst_45 = arith.constant dense<0xFF800000> : vector<256xf32>
    %113 = vector.multi_reduction <maximumf>, %112, %cst_45 [0] : vector<6x256xf32> to vector<256xf32>
    %114 = vector.shape_cast %113 : vector<256xf32> to vector<1x256xf32>
    %115 = vector.broadcast %114 : vector<1x256xf32> to vector<6x256xf32>
    %116 = arith.subf %112, %115 : vector<6x256xf32>
    %117 = math.exp %116 : vector<6x256xf32>
    %cst_46 = arith.constant dense<0.000000e+00> : vector<256xf32>
    %118 = vector.multi_reduction <add>, %117, %cst_46 [0] : vector<6x256xf32> to vector<256xf32>
    %119 = vector.shape_cast %118 : vector<256xf32> to vector<1x256xf32>
    %120 = tpu.reciprocal %119 {approx = true} : vector<1x256xf32> -> vector<1x256xf32>
    %121 = vector.broadcast %120 : vector<1x256xf32> to vector<6x256xf32>
    %122 = arith.mulf %117, %121 : vector<6x256xf32>
    %123 = vector.broadcast %120 : vector<1x256xf32> to vector<32x256xf32>
    %124 = vector.broadcast %2 : vector<32x1xf32> to vector<32x256xf32>
    %125 = arith.mulf %123, %124 : vector<32x256xf32>
    %cst_47 = arith.constant 1.000000e+00 : f32
    %126 = vector.broadcast %cst_47 : f32 to vector<32x256xf32>
    %127 = arith.addf %126, %125 : vector<32x256xf32>
    %128 = arith.mulf %98, %127 : vector<32x256xf32>
    %129 = vector.broadcast %3 : vector<32x1xf32> to vector<32x256xf32>
    %130 = arith.addf %128, %129 : vector<32x256xf32>
    %131 = vector.extract_strided_slice %130 {offsets = [0, 255], sizes = [32, 1], strides = [1, 1]} : vector<32x256xf32> to vector<32x1xf32>
    %132 = vector.extract_strided_slice %130 {offsets = [0, 0], sizes = [32, 255], strides = [1, 1]} : vector<32x256xf32> to vector<32x255xf32>
    %133 = tpu.concatenate %131, %132 in 1 : vector<32x1xf32>, vector<32x255xf32> -> vector<32x256xf32>
    %134 = vector.broadcast %6 : vector<1x256xf32> to vector<32x256xf32>
    %135 = arith.mulf %133, %134 : vector<32x256xf32>
    %136 = vector.extract_strided_slice %130 {offsets = [0, 1], sizes = [32, 255], strides = [1, 1]} : vector<32x256xf32> to vector<32x255xf32>
    %137 = vector.extract_strided_slice %130 {offsets = [0, 0], sizes = [32, 1], strides = [1, 1]} : vector<32x256xf32> to vector<32x1xf32>
    %138 = tpu.concatenate %136, %137 in 1 : vector<32x255xf32>, vector<32x1xf32> -> vector<32x256xf32>
    %139 = vector.broadcast %7 : vector<1x256xf32> to vector<32x256xf32>
    %140 = arith.mulf %138, %139 : vector<32x256xf32>
    %cst_48 = arith.constant dense<0.000000e+00> : vector<96x256xf32>
    %141 = tpu.matmul %11, %135, %cst_48 {dimension_numbers = #tpu.dot_dimension_numbers<[1], [0], [0], [1], [0, 0, 1, 1], [], []>} : vector<96x32xf32>, vector<32x256xf32>, vector<96x256xf32> -> vector<96x256xf32>
    %cst_49 = arith.constant dense<0.000000e+00> : vector<96x256xf32>
    %142 = tpu.matmul %13, %130, %cst_49 {dimension_numbers = #tpu.dot_dimension_numbers<[1], [0], [0], [1], [0, 0, 1, 1], [], []>} : vector<96x32xf32>, vector<32x256xf32>, vector<96x256xf32> -> vector<96x256xf32>
    %143 = arith.addf %141, %142 : vector<96x256xf32>
    %cst_50 = arith.constant dense<0.000000e+00> : vector<96x256xf32>
    %144 = tpu.matmul %15, %140, %cst_50 {dimension_numbers = #tpu.dot_dimension_numbers<[1], [0], [0], [1], [0, 0, 1, 1], [], []>} : vector<96x32xf32>, vector<32x256xf32>, vector<96x256xf32> -> vector<96x256xf32>
    %145 = arith.addf %143, %144 : vector<96x256xf32>
    %146 = vector.extract_strided_slice %145 {offsets = [32, 0], sizes = [32, 256], strides = [1, 1]} : vector<96x256xf32> to vector<32x256xf32>
    %147 = vector.broadcast %4 : vector<32x1xf32> to vector<32x256xf32>
    %148 = arith.addf %146, %147 : vector<32x256xf32>
    %149 = vector.extract_strided_slice %145 {offsets = [0, 0], sizes = [32, 256], strides = [1, 1]} : vector<96x256xf32> to vector<32x256xf32>
    %150 = vector.extract_strided_slice %149 {offsets = [0, 240], sizes = [32, 16], strides = [1, 1]} : vector<32x256xf32> to vector<32x16xf32>
    %151 = vector.extract_strided_slice %149 {offsets = [0, 0], sizes = [32, 240], strides = [1, 1]} : vector<32x256xf32> to vector<32x240xf32>
    %152 = tpu.concatenate %150, %151 in 1 : vector<32x16xf32>, vector<32x240xf32> -> vector<32x256xf32>
    %153 = vector.broadcast %8 : vector<1x256xf32> to vector<32x256xf32>
    %154 = arith.mulf %152, %153 : vector<32x256xf32>
    %155 = arith.addf %148, %154 : vector<32x256xf32>
    %156 = vector.extract_strided_slice %145 {offsets = [64, 0], sizes = [32, 256], strides = [1, 1]} : vector<96x256xf32> to vector<32x256xf32>
    %157 = vector.extract_strided_slice %156 {offsets = [0, 16], sizes = [32, 240], strides = [1, 1]} : vector<32x256xf32> to vector<32x240xf32>
    %158 = vector.extract_strided_slice %156 {offsets = [0, 0], sizes = [32, 16], strides = [1, 1]} : vector<32x256xf32> to vector<32x16xf32>
    %159 = tpu.concatenate %157, %158 in 1 : vector<32x240xf32>, vector<32x16xf32> -> vector<32x256xf32>
    %160 = vector.broadcast %9 : vector<1x256xf32> to vector<32x256xf32>
    %161 = arith.mulf %159, %160 : vector<32x256xf32>
    %162 = arith.addf %155, %161 : vector<32x256xf32>
    %c1_51 = arith.constant 1 : index
    %c0_52 = arith.constant 0 : index
    %c0_53 = arith.constant 0 : index
    %163 = vector.load %arg9[%c1_51, %c0_52, %c0_53] : memref<2x32x256xf32, #tpu.memory_space<vmem>>, vector<1x32x256xf32>
    %164 = vector.shape_cast %163 : vector<1x32x256xf32> to vector<32x256xf32>
    %165 = vector.shape_cast %162 : vector<32x256xf32> to vector<1x32x256xf32>
    tpu.vector_store %arg9[%c1_51, %c0_52, %c0_53], %165 {strides = array<i32>} : memref<2x32x256xf32, #tpu.memory_space<vmem>>, vector<1x32x256xf32>,
    %c1_54 = arith.constant 1 : index
    %c0_55 = arith.constant 0 : index
    %c0_56 = arith.constant 0 : index
    %166 = vector.load %arg10[%c1_54, %c0_55, %c0_56] : memref<2x6x256xf32, #tpu.memory_space<vmem>>, vector<1x6x256xf32>
    %167 = vector.shape_cast %166 : vector<1x6x256xf32> to vector<6x256xf32>
    %168 = vector.shape_cast %122 : vector<6x256xf32> to vector<1x6x256xf32>
    tpu.vector_store %arg10[%c1_54, %c0_55, %c0_56], %168 {strides = array<i32>} : memref<2x6x256xf32, #tpu.memory_space<vmem>>, vector<1x6x256xf32>,
    %cst_57 = arith.constant dense<0.000000e+00> : vector<32xf32>
    %169 = vector.multi_reduction <add>, %162, %cst_57 [1] : vector<32x256xf32> to vector<32xf32>
    %170 = vector.shape_cast %169 : vector<32xf32> to vector<32x1xf32>
    %171 = arith.addf %92, %170 : vector<32x1xf32>
    %172 = arith.mulf %162, %162 : vector<32x256xf32>
    %cst_58 = arith.constant dense<0.000000e+00> : vector<32xf32>
    %173 = vector.multi_reduction <add>, %172, %cst_58 [1] : vector<32x256xf32> to vector<32xf32>
    %174 = vector.shape_cast %173 : vector<32xf32> to vector<32x1xf32>
    %175 = arith.addf %96, %174 : vector<32x1xf32>
    %176 = tpu.concatenate %171, %175 in 1 : vector<32x1xf32>, vector<32x1xf32> -> vector<32x2xf32>
    %c0_59 = arith.constant 0 : index
    %c0_60 = arith.constant 0 : index
    %c0_61 = arith.constant 0 : index
    %177 = vector.load %arg11[%c0_59, %c0_60, %c0_61] : memref<1x32x2xf32, #tpu.memory_space<vmem>>, vector<1x32x2xf32>
    %178 = vector.shape_cast %177 : vector<1x32x2xf32> to vector<32x2xf32>
    %179 = vector.shape_cast %176 : vector<32x2xf32> to vector<1x32x2xf32>
    tpu.vector_store %arg11[%c0_59, %c0_60, %c0_61], %179 {strides = array<i32>} : memref<1x32x2xf32, #tpu.memory_space<vmem>>, vector<1x32x2xf32>,
    return
  }
  func.func @transform_0(%arg0: i32) -> (i32, i32, i32) {
    %c0_i32 = arith.constant 0 : i32
    %c0_i32_0 = arith.constant 0 : i32
    %c0_i32_1 = arith.constant 0 : i32
    return %arg0, %c0_i32, %c0_i32_0 : i32, i32, i32
  }
  func.func @transform_1(%arg0: i32) -> (i32, i32) {
    %c0_i32 = arith.constant 0 : i32
    %c0_i32_0 = arith.constant 0 : i32
    %c0_i32_1 = arith.constant 0 : i32
    return %c0_i32, %c0_i32_0 : i32, i32
  }
  func.func @transform_2(%arg0: i32) -> (i32, i32) {
    %c0_i32 = arith.constant 0 : i32
    %c0_i32_0 = arith.constant 0 : i32
    %c0_i32_1 = arith.constant 0 : i32
    return %c0_i32, %c0_i32_0 : i32, i32
  }
  func.func @transform_3(%arg0: i32) -> (i32, i32) {
    %c0_i32 = arith.constant 0 : i32
    %c0_i32_0 = arith.constant 0 : i32
    %c0_i32_1 = arith.constant 0 : i32
    return %c0_i32, %c0_i32_0 : i32, i32
  }
  func.func @transform_4(%arg0: i32) -> (i32, i32) {
    %c0_i32 = arith.constant 0 : i32
    %c0_i32_0 = arith.constant 0 : i32
    %c0_i32_1 = arith.constant 0 : i32
    return %c0_i32, %c0_i32_0 : i32, i32
  }
  func.func @transform_5(%arg0: i32) -> (i32, i32, i32) {
    %c0_i32 = arith.constant 0 : i32
    %c0_i32_0 = arith.constant 0 : i32
    %c0_i32_1 = arith.constant 0 : i32
    %c0_i32_2 = arith.constant 0 : i32
    return %c0_i32, %c0_i32_0, %c0_i32_1 : i32, i32, i32
  }
  func.func @transform_6(%arg0: i32) -> (i32, i32) {
    %c0_i32 = arith.constant 0 : i32
    %c0_i32_0 = arith.constant 0 : i32
    %c0_i32_1 = arith.constant 0 : i32
    return %c0_i32, %c0_i32_0 : i32, i32
  }
  func.func @transform_7(%arg0: i32) -> (i32, i32) {
    %c0_i32 = arith.constant 0 : i32
    %c0_i32_0 = arith.constant 0 : i32
    %c0_i32_1 = arith.constant 0 : i32
    return %c0_i32, %c0_i32_0 : i32, i32
  }
  func.func @transform_8(%arg0: i32) -> (i32, i32, i32) {
    %c0_i32 = arith.constant 0 : i32
    %c0_i32_0 = arith.constant 0 : i32
    %c0_i32_1 = arith.constant 0 : i32
    return %arg0, %c0_i32, %c0_i32_0 : i32, i32, i32
  }
  func.func @transform_9(%arg0: i32) -> (i32, i32, i32) {
    %c0_i32 = arith.constant 0 : i32
    %c0_i32_0 = arith.constant 0 : i32
    %c0_i32_1 = arith.constant 0 : i32
    return %arg0, %c0_i32, %c0_i32_0 : i32, i32, i32
  }
  func.func @transform_10(%arg0: i32) -> (i32, i32, i32) {
    %c0_i32 = arith.constant 0 : i32
    %c0_i32_0 = arith.constant 0 : i32
    %c0_i32_1 = arith.constant 0 : i32
    return %arg0, %c0_i32, %c0_i32_0 : i32, i32, i32
  }
}

</mosaic_0001>

<bundles_post_ra>
// kernel: unsupervised_semantic_discovery.3
= control target key start
LH: loop header
LB: loop body
LE: loop exit
PB: predicated region body
PF: predicated region fallthrough
CT: control target
= control target key end

     0   :  { %v149_v0 = vmov 0   ;;  %s290_s1 = inlined_call_operand.vmem [shape: f32[32,1], index: 1, kind: input, shape index: {}]   ;;  %s291_s2 = inlined_call_operand.vmem [shape: f32[32,1], index: 2, kind: input, shape index: {}]   ;;  %s292_s0 = inlined_call_operand.vmem [shape: f32[2,32,256], index: 0, kind: input, shape index: {}, may-alias: {0,3}]   ;;  %s293_s3 = inlined_call_operand.vmem [shape: f32[2,32,256], index: 3, kind: output, shape index: {}, may-alias: {0,3}]  }
   0x1   :  { %148 = vset.pattern.permute.xlu1 %v149_v0  ;;  %147 = vset.pattern.permute.xlu0 %v149_v0  ;;  %v32_v1 = vld [vmem:[%s290_s1 + $0x10] sm:$0xff]  ;;  %v30_v2 = vld [vmem:[%s290_s1] sm:$0xff]  ;;  %v33_v3 = vld [vmem:[%s290_s1 + $0x18] sm:$0xff] }
   0x2   :  { %46 = vperm.xlu1 %148, %v32_v1   ;;  %36 = vperm.xlu0 %147, %v30_v2   ;;  %v31_v4 = vld [vmem:[%s290_s1 + $0x8] sm:$0xff]  ;;  %v70_v6 = vld [vmem:[%s291_s2] sm:$0xff]  ;;  %v73_v7 = vld [vmem:[%s291_s2 + $0x18] sm:$0xff] }
   0x3   :  { %v71_v5 = vld [vmem:[%s291_s2 + $0x8] sm:$0xff]  ;;  %v72_v8 = vld [vmem:[%s291_s2 + $0x10] sm:$0xff]  ;;  %v14_v11 = vld [vmem:[%s292_s0] sm:$0xff] }
   0x4   :  { %v15_v12 = vld [vmem:[%s292_s0 + $0x8] sm:$0xff]  ;;  %v22_v13 = vld [vmem:[%s292_s0 + $0x40] sm:$0xff]  ;;  %v16_v15 = vld [vmem:[%s292_s0 + $0x10] sm:$0xff] }
   0x5   :  { %v23_v14 = vld [vmem:[%s292_s0 + $0x48] sm:$0xff]  ;;  %v17_v16 = vld [vmem:[%s292_s0 + $0x18] sm:$0xff]  ;;  %v18_v17 = vld [vmem:[%s292_s0 + $0x20] sm:$0xff] }
   0x6   :  { %51 = vperm.xlu1 %148, %v33_v3   ;;  %41 = vperm.xlu0 %147, %v31_v4   ;;  %v19_v18 = vld [vmem:[%s292_s0 + $0x28] sm:$0xff]  ;;  %v26_v19 = vld [vmem:[%s292_s0 + $0x60] sm:$0xff]  ;;  %v24_v23 = vld [vmem:[%s292_s0 + $0x50] sm:$0xff] }
   0x7   :  { %v27_v20 = vld [vmem:[%s292_s0 + $0x68] sm:$0xff]  ;;  %v25_v24 = vld [vmem:[%s292_s0 + $0x58] sm:$0xff]  ;;  %v20_v25 = vld [vmem:[%s292_s0 + $0x30] sm:$0xff] }
   0x8   :  { %v21_v30 = vld [vmem:[%s292_s0 + $0x38] sm:$0xff]  ;;  %v28_v31 = vld [vmem:[%s292_s0 + $0x70] sm:$0xff] }
   0x9   :  { %v29_v32 = vld [vmem:[%s292_s0 + $0x78] sm:$0xff] }
   0xa   :  { %81 = vperm.xlu1 %148, %v71_v5   ;;  %76 = vperm.xlu0 %147, %v70_v6  }
   0xe   :  { %91 = vperm.xlu1 %148, %v73_v7   ;;  %86 = vperm.xlu0 %147, %v72_v8  }
  0x7d   :  { %v47_v9 = vpop.permute.xlu1 %46  ;;  %v37_v10 = vpop.permute.xlu0 %36 }
  0x7e   :  { %v54_v26 = vmul.f32 %v37_v10, %v14_v11  ;;  %v55_v27 = vmul.f32 %v37_v10, %v15_v12  ;;  %v62_v28 = vmul.f32 %v37_v10, %v22_v13  ;;  %v63_v29 = vmul.f32 %v37_v10, %v23_v14 }
  0x7f   :  { %v58_v33 = vmul.f32 %v47_v9, %v18_v17  ;;  %v59_v34 = vmul.f32 %v47_v9, %v19_v18  ;;  %v66_v35 = vmul.f32 %v47_v9, %v26_v19  ;;  %v67_v36 = vmul.f32 %v47_v9, %v27_v20 }
  0x81   :  { %v52_v21 = vpop.permute.xlu1 %51  ;;  %v42_v22 = vpop.permute.xlu0 %41 }
  0x82   :  { %v56_v37 = vmul.f32 %v42_v22, %v16_v15  ;;  %v57_v38 = vmul.f32 %v42_v22, %v17_v16  ;;  %v64_v39 = vmul.f32 %v42_v22, %v24_v23  ;;  %v65_v40 = vmul.f32 %v42_v22, %v25_v24 }
  0x83   :  { %v60_v43 = vmul.f32 %v52_v21, %v20_v25  ;;  %v61_v44 = vmul.f32 %v52_v21, %v21_v30  ;;  %v68_v45 = vmul.f32 %v52_v21, %v28_v31  ;;  %v69_v46 = vmul.f32 %v52_v21, %v29_v32 }
  0x85   :  { %v82_v41 = vpop.permute.xlu1 %81  ;;  %v77_v42 = vpop.permute.xlu0 %76 }
  0x86   :  { %v96_v47 = vadd.f32 %v82_v41, %v56_v37  ;;  %v97_v48 = vadd.f32 %v82_v41, %v57_v38  ;;  %v104_v49 = vadd.f32 %v82_v41, %v64_v39  ;;  %v105_v50 = vadd.f32 %v82_v41, %v65_v40 }
  0x87   :  { %v94_v51 = vadd.f32 %v77_v42, %v54_v26  ;;  %v95_v52 = vadd.f32 %v77_v42, %v55_v27  ;;  %v102_v53 = vadd.f32 %v77_v42, %v62_v28  ;;  %v103_v54 = vadd.f32 %v77_v42, %v63_v29 }
  0x88   :  { %v112_v55 = vmax.f32 %v96_v47, 0.0  ;;  %v113_v56 = vmax.f32 %v97_v48, 0.0  ;;  %v120_v57 = vmax.f32 %v104_v49, 0.0  ;;  %v121_v58 = vmax.f32 %v105_v50, 0.0 }
  0x89   :  { %v110_v59 = vmax.f32 %v94_v51, 0.0  ;;  %v111_v60 = vmax.f32 %v95_v52, 0.0  ;;  %v118_v61 = vmax.f32 %v102_v53, 0.0  ;;  %v119_v62 = vmax.f32 %v103_v54, 0.0  ;;  %v92_v63 = vpop.permute.xlu1 %91  ;;  %v87_v0 = vpop.permute.xlu0 %86 }
  0x8a   :  { %128 = vst [vmem:[%s293_s3 + $0x10] sm:$0xff] %v112_v55  ;;  %129 = vst [vmem:[%s293_s3 + $0x18] sm:$0xff] %v113_v56  ;;  %v100_v1 = vadd.f32 %v92_v63, %v60_v43  ;;  %v101_v2 = vadd.f32 %v92_v63, %v61_v44  ;;  %v108_v3 = vadd.f32 %v92_v63, %v68_v45 }
  0x8b   :  { %136 = vst [vmem:[%s293_s3 + $0x50] sm:$0xff] %v120_v57  ;;  %137 = vst [vmem:[%s293_s3 + $0x58] sm:$0xff] %v121_v58  ;;  %v109_v4 = vadd.f32 %v92_v63, %v69_v46  ;;  %v98_v5 = vadd.f32 %v87_v0, %v58_v33  ;;  %v99_v6 = vadd.f32 %v87_v0, %v59_v34 }
  0x8c   :  { %126 = vst [vmem:[%s293_s3] sm:$0xff] %v110_v59  ;;  %127 = vst [vmem:[%s293_s3 + $0x8] sm:$0xff] %v111_v60  ;;  %v106_v7 = vadd.f32 %v87_v0, %v66_v35  ;;  %v107_v8 = vadd.f32 %v87_v0, %v67_v36  ;;  %v116_v9 = vmax.f32 %v100_v1, 0.0  ;;  %v117_v10 = vmax.f32 %v101_v2, 0.0 }
  0x8d   :  { %134 = vst [vmem:[%s293_s3 + $0x40] sm:$0xff] %v118_v61  ;;  %135 = vst [vmem:[%s293_s3 + $0x48] sm:$0xff] %v119_v62  ;;  %v124_v11 = vmax.f32 %v108_v3, 0.0  ;;  %v125_v12 = vmax.f32 %v109_v4, 0.0  ;;  %v114_v13 = vmax.f32 %v98_v5, 0.0  ;;  %v115_v14 = vmax.f32 %v99_v6, 0.0 }
  0x8e   :  { %v122_v15 = vmax.f32 %v106_v7, 0.0  ;;  %v123_v16 = vmax.f32 %v107_v8, 0.0  ;;  %132 = vst [vmem:[%s293_s3 + $0x30] sm:$0xff] %v116_v9  ;;  %133 = vst [vmem:[%s293_s3 + $0x38] sm:$0xff] %v117_v10 }
  0x8f   :  { %140 = vst [vmem:[%s293_s3 + $0x70] sm:$0xff] %v124_v11  ;;  %141 = vst [vmem:[%s293_s3 + $0x78] sm:$0xff] %v125_v12 }
  0x90   :  { %130 = vst [vmem:[%s293_s3 + $0x20] sm:$0xff] %v114_v13  ;;  %131 = vst [vmem:[%s293_s3 + $0x28] sm:$0xff] %v115_v14 }
  0x91   :  { %138 = vst [vmem:[%s293_s3 + $0x60] sm:$0xff] %v122_v15  ;;  %139 = vst [vmem:[%s293_s3 + $0x68] sm:$0xff] %v123_v16 }

// kernel: unsupervised_semantic_discovery.2
= control target key start
LH: loop header
LB: loop body
LE: loop exit
PB: predicated region body
PF: predicated region fallthrough
CT: control target
= control target key end

     0   :  { %v3641_v3 = vmov 0.0   ;;  %v2322_v4 = vmov 0   ;;  %vm94_vm0 = vcmask 261120   ;;  %vm219_vm1 = vcmask 1045504   ;;  %s2323_s11 = smov 1   ;;  %s2324_s17 = smov 127   ;;  %s3627_s0 = inlined_call_operand.vmem [shape: f32[2,32,256], index: 0, kind: input, shape index: {}]   ;;  %s3628_s2 = inlined_call_operand.vmem [shape: f32[6,1], index: 2, kind: input, shape index: {}]   ;;  %s3629_s3 = inlined_call_operand.vmem [shape: f32[32,1], index: 3, kind: input, shape index: {}]   ;;  %s3630_s1 = inlined_call_operand.vmem [shape: f32[16,32], index: 1, kind: input, shape index: {}]   ;;  %s3631_s4 = inlined_call_operand.vmem [shape: f32[32,1], index: 4, kind: input, shape index: {}]   ;;  %s3632_s9 = inlined_call_operand.vmem [shape: f32[2,6,256], index: 9, kind: output, shape index: {1}]   ;;  %s3633_s5 = inlined_call_operand.vmem [shape: f32[3,96,32], index: 5, kind: input, shape index: {}]   ;;  %s3634_s7 = inlined_call_operand.vmem [shape: f32[4,256], index: 7, kind: input, shape index: {}]   ;;  %s3635_s6 = inlined_call_operand.vmem [shape: f32[32,1], index: 6, kind: input, shape index: {}]   ;;  %s3636_s8 = inlined_call_operand.vmem [shape: f32[2,32,256], index: 8, kind: output, shape index: {0}]   ;;  %s3637_s10 = inlined_call_operand.vmem [shape: f32[1,32,2], index: 10, kind: output, shape index: {2}]  }
   0x1   :  { %v2385_v0 = vld [vmem:[%s3627_s0 + $0x38] sm:$0xff]  ;;  %v2390_v1 = vld [vmem:[%s3627_s0 + $0x30] sm:$0xff]  ;;  %v2395_v2 = vld [vmem:[%s3627_s0 + $0x28] sm:$0xff]  ;;  %165 = vmatprep.mubr.f32.mxu1 %v3641_v3  ;;  %2292 = vset.pattern.permute.xlu0 %v2322_v4  ;;  %vm358_vm2 = vcmask 7168   ;;  %vm418_vm3 = vcmask 1039360   ;;  %s2326_s20 = smov 112  }
   0x2   :  { %125 = vmatprep.subr.mxu1 %v2385_v0  ;;  %v2402_v5 = vld [vmem:[%s3627_s0 + $0x20] sm:$0xff]  ;;  %2293 = vset.pattern.permute.xlu1 %v2322_v4  ;;  %v2408_v6 = vld [vmem:[%s3627_s0 + $0x18] sm:$0xff]  ;;  %v2415_v7 = vld [vmem:[%s3627_s0 + $0x10] sm:$0xff]  ;;  %v183_v27 = vmul.f32 %v2395_v2, %v2395_v2  ;;  %v184_v29 = vmul.f32 %v2390_v1, %v2390_v1  ;;  %v185_v31 = vmul.f32 %v2385_v0, %v2385_v0  ;;  %vm1064_vm4 = vcmask 130048  }
   0x3   :  { %126 = vmatpush1.msra.mxu1 %v2390_v1  ;;  %738 = vmatprep.mubr.f32.mxu0 %v3641_v3  ;;  %v34_v8 = vld [vmem:[%s3628_s2] sm:$0x3f]  ;;  %v2424_v9 = vld [vmem:[%s3627_s0 + $0x8] sm:$0xff]  ;;  %v38_v11 = vld [vmem:[%s3629_s3 + $0x18] sm:$0xff]  ;;  %v180_v21 = vmul.f32 %v2415_v7, %v2415_v7  ;;  %v181_v23 = vmul.f32 %v2408_v6, %v2408_v6  ;;  %v182_v25 = vmul.f32 %v2402_v5, %v2402_v5  ;;  %vm1139_vm5 = vcmask 916480  }
   0x4   :  { %127 = vmatprep.subr.mxu1 %v2395_v2  ;;  %210 = vperm.xlu0 %2292, %v34_v8   ;;  %v2430_v10 = vld [vmem:[%s3627_s0] sm:$0xff]  ;;  %v37_v12 = vld [vmem:[%s3629_s3 + $0x10] sm:$0xff]  ;;  %v36_v14 = vld [vmem:[%s3629_s3 + $0x8] sm:$0xff]  ;;  %v179_v24 = vmul.f32 %v2424_v9, %v2424_v9  ;;  %vm2151_vm6 = vcmask 15360  }
   0x5   :  { %128 = vmatpush1.msra.mxu1 %v2402_v5  ;;  %v2442_v13 = vld [vmem:[%s3630_s1] sm:$0xff]  ;;  %270 = vperm.xlu1 %2293, %v37_v12   ;;  %v2458_v16 = vld [vmem:[%s3630_s1 + $0x8] sm:$0xff]  ;;  %v42_v17 = vld [vmem:[%s3631_s4 + $0x18] sm:$0xff]  ;;  %v178_v22 = vmul.f32 %v2430_v10, %v2430_v10 }
   0x6   :  { %129 = vmatprep.subr.mxu1 %v2408_v6  ;;  %v35_v15 = vld [vmem:[%s3629_s3] sm:$0xff]  ;;  %v41_v18 = vld [vmem:[%s3631_s4 + $0x10] sm:$0xff]  ;;  %v40_v19 = vld [vmem:[%s3631_s4 + $0x8] sm:$0xff]  ;;  %v195_v28 = vadd.f32 %v181_v23, %v179_v24 }
   0x7   :  { %130 = vmatpush1.msra.mxu1 %v2415_v7  ;;  %v39_v20 = vld [vmem:[%s3631_s4] sm:$0xff]  ;;  %v186_v26 = vadd.f32 %v180_v21, %v178_v22 }
   0x8   :  { %131 = vmatprep.subr.mxu1 %v2424_v9  ;;  %275 = vperm.xlu0 %2292, %v38_v11   ;;  %v196_v32 = vadd.f32 %v195_v28, %v183_v27 }
   0x9   :  { %132 = vmatpush1.msra.mxu1 %v2430_v10  ;;  %265 = vperm.xlu1 %2293, %v36_v14   ;;  %v187_v30 = vadd.f32 %v186_v26, %v182_v25 }
   0xa   :  { %2192 = vmatmul.mubr.msk.f32.vlgmr.msra.gmra.mxu1 %vm94_vm0, %v2442_v13  ;;  %v197_v34 = vadd.f32 %v196_v32, %v185_v31 }
   0xb   :  { %171 = vmatprep.mubr.f32.mxu1 %v3641_v3  ;;  %v188_v33 = vadd.f32 %v187_v30, %v184_v29 }
   0xc   :  { %260 = vperm.xlu0 %2292, %v35_v15   ;;  %v198_v36 = vrot.slane %v197_v34, 4 }
   0xd   :  { %319 = vperm.xlu1 %2293, %v42_v17   ;;  %v189_v35 = vrot.slane %v188_v33, 4 }
   0xe   :  { %2193 = vmatmul.mubr.msk.f32.gmra.mxu1 %vm94_vm0, %v2458_v16  ;;  %v199_v38 = vadd.f32 %v198_v36, %v197_v34 }
   0xf   :  { %565 = vmatprep.mubr.f32.mxu1 %v3641_v3  ;;  %v190_v37 = vadd.f32 %v189_v35, %v188_v33 }
  0x10   :  { %314 = vperm.xlu0 %2292, %v41_v18   ;;  %v200_v40 = vrot.slane %v199_v38, 2 }
  0x11   :  { %309 = vperm.xlu1 %2293, %v40_v19   ;;  %v191_v39 = vrot.slane %v190_v37, 2 }
  0x12   :  { %v201_v42 = vadd.f32 %v200_v40, %v199_v38 }
  0x13   :  { %v192_v41 = vadd.f32 %v191_v39, %v190_v37 }
  0x14   :  { %304 = vperm.xlu0 %2292, %v39_v20   ;;  %v202_v44 = vrot.slane %v201_v42, 1 }
  0x15   :  { %v193_v43 = vrot.slane %v192_v41, 1 }
  0x16   :  { %v203_v46 = vadd.f32 %v202_v44, %v201_v42 }
  0x17   :  { %v194_v45 = vadd.f32 %v193_v43, %v192_v41 }
  0x18   :  { %v205_v48 = vmax.f32 %v203_v46, 1e-24 }
  0x19   :  { %v204_v47 = vmax.f32 %v194_v45, 1e-24 }
  0x1b   :  { %2294 = vrsqrt.f32 %v204_v47 }
  0x1c   :  { %2296 = vrsqrt.f32 %v205_v48 }
  0x28   :  { %v2295_v50 = vpop.eup %2294 }
  0x29   :  { %v2297_v52 = vpop.eup %2296 }
  0x7f   :  { %v2491_v53 = vpop.permute.xlu0 %210 }
  0x80   :  { %v2499_v43 = vpop.permute.xlu1 %270 }
  0x83   :  { %v2501_v44 = vpop.permute.xlu0 %275 }
  0x84   :  { %v2504_v48 = vpop.permute.xlu1 %265 }
  0xca   :  { %v167_v49 = vpop.f32.mrf.mxu1 }
  0xcb   :  { %v213_v55 = vadd.f32 %v2491_v53, %v167_v49 }
  0xcc   :  { %v169_v51 = vpop.f32.mrf.mxu1 }
  0xcd   :  { %v214_v58 = vadd.f32 %v2491_v53, %v169_v51  ;;  %v2507_v51 = vpop.permute.xlu0 %260 }
  0xce   :  { %v173_v54 = vpop.f32.mrf.mxu1 }
  0xcf   :  { %v215_v56 = vmul.f32 %v2295_v50, %v173_v54 }
  0xd0   :  { %v175_v57 = vpop.f32.mrf.mxu1 }
  0xd1   :  { %v217_v59 = vadd.f32 %v215_v56, %v213_v55  ;;  %v216_v60 = vmul.f32 %v2297_v52, %v175_v57 }
  0xd3   :  { %v220_v61 = vsel %vm219_vm1, %v217_v59, -inf  ;;  %v218_v62 = vadd.f32 %v216_v60, %v214_v58 }
  0xd4   :  { %v221_v63 = vrot.slane %v220_v61, 4 }
  0xd5   :  { %v227_v4 = vsel %vm219_vm1, %v218_v62, -inf }
  0xd6   :  { %v222_v8 = vmax.f32 %v220_v61, %v221_v63  ;;  %v228_v11 = vrot.slane %v227_v4, 4 }
  0xd8   :  { %v223_v12 = vrot.slane %v222_v8, 2  ;;  %v229_v14 = vmax.f32 %v227_v4, %v228_v11 }
  0xda   :  { %v224_v15 = vmax.f32 %v222_v8, %v223_v12  ;;  %v230_v17 = vrot.slane %v229_v14, 2  ;;  %v2522_v12 = vpop.permute.xlu1 %319 }
  0xdc   :  { %v225_v18 = vrot.slane %v224_v15, 1  ;;  %v231_v19 = vmax.f32 %v229_v14, %v230_v17 }
  0xde   :  { %v226_v20 = vmax.f32 %v224_v15, %v225_v18  ;;  %v232_v21 = vrot.slane %v231_v19, 1 }
  0xe0   :  { %v234_v22 = vsub.f32 %v217_v59, %v226_v20  ;;  %v233_v23 = vmax.f32 %v231_v19, %v232_v21  ;;  %v2528_v20 = vpop.permute.xlu0 %314 }
  0xe2   :  { %v236_v24 = vmul.f32 1.442695, %v234_v22  ;;  %v235_v25 = vsub.f32 %v218_v62, %v233_v23 }
  0xe4   :  { %2298 = vpow2.f32 %v236_v24  ;;  %v238_v26 = vmul.f32 1.442695, %v235_v25  ;;  %v2539_v25 = vpop.permute.xlu1 %309 }
  0xe6   :  { %2300 = vpow2.f32 %v238_v26 }
  0xf1   :  { %v2299_v27 = vpop.eup %2298 }
  0xf2   :  { %v240_v28 = vsel %vm219_vm1, %v2299_v27, 0.0 }
  0xf3   :  { %v2301_v29 = vpop.eup %2300  ;;  %v241_v30 = vrot.slane %v240_v28, 4 }
  0xf4   :  { %v247_v31 = vsel %vm219_vm1, %v2301_v29, 0.0 }
  0xf5   :  { %v242_v32 = vadd.f32 %v241_v30, %v240_v28  ;;  %v248_v33 = vrot.slane %v247_v31, 4  ;;  %v2562_v28 = vld [vmem:[%s3633_s5 + $0x68] sm:$0xff]  ;;  %v2582_v30 = vld [vmem:[%s3633_s5 + $0x78] sm:$0xff] }
  0xf7   :  { %v243_v34 = vrot.slane %v242_v32, 2  ;;  %v249_v35 = vadd.f32 %v248_v33, %v247_v31  ;;  %v2592_v31 = vld [vmem:[%s3633_s5 + $0x80] sm:$0xff]  ;;  %v2612_v33 = vld [vmem:[%s3633_s5 + $0x90] sm:$0xff] }
  0xf9   :  { %v244_v36 = vadd.f32 %v243_v34, %v242_v32  ;;  %v250_v37 = vrot.slane %v249_v35, 2  ;;  %v2602_v32 = vld [vmem:[%s3633_s5 + $0x88] sm:$0xff]  ;;  %v2620_v34 = vld [vmem:[%s3633_s5 + $0x98] sm:$0xff] }
  0xfb   :  { %v245_v38 = vrot.slane %v244_v36, 1  ;;  %v251_v39 = vadd.f32 %v250_v37, %v249_v35  ;;  %v2628_v35 = vld [vmem:[%s3633_s5 + $0xa0] sm:$0xff]  ;;  %v2644_v37 = vld [vmem:[%s3633_s5 + $0xb0] sm:$0xff] }
  0xfc   :  { %3676 = vst [vmem:[#allocation2_spill] sm:$0xff] %v2628_v35  ;;  %3678 = vst [vmem:[#allocation4_spill] sm:$0xff] %v2644_v37 }
  0xfd   :  { %v246_v40 = vadd.f32 %v245_v38, %v244_v36  ;;  %v252_v41 = vrot.slane %v251_v39, 1  ;;  %v2636_v36 = vld [vmem:[%s3633_s5 + $0xa8] sm:$0xff]  ;;  %v2652_v38 = vld [vmem:[%s3633_s5 + $0xb8] sm:$0xff] }
  0xfe   :  { %3677 = vst [vmem:[#allocation3_spill] sm:$0xff] %v2636_v36  ;;  %3679 = vst [vmem:[#allocation5_spill] sm:$0xff] %v2652_v38 }
  0xff   :  { %2302 = vrcp.f32 %v246_v40  ;;  %v253_v42 = vadd.f32 %v252_v41, %v251_v39  ;;  %v376_v39 = vlaneseq }
 0x101   :  { %2304 = vrcp.f32 %v253_v42  ;;  %v2657_v40 = vshrl.u32 %v376_v39, 7  ;;  %v2693_v39 = vld [vmem:[%s3633_s5] sm:$0xff] }
 0x102   :  { %3685 = vst [vmem:[#allocation11_spill] sm:$0xff] %v2693_v39 }
 0x103   :  { %3680 = vst [vmem:[#allocation6_spill] sm:$0xff] %v2657_v40  ;;  %v378_v41 = vsub.s32 0, %v2657_v40  ;;  %v382_v42 = vsub.s32 4, %v2657_v40 }
 0x10c   :  { %v2303_v45 = vpop.eup %2302 }
 0x10d   :  { %v256_v46 = vmul.f32 %v2303_v45, %v2299_v27  ;;  %v282_v47 = vmul.f32 %v2303_v45, %v2499_v43  ;;  %v284_v50 = vmul.f32 %v2303_v45, %v2501_v44  ;;  %v280_v56 = vmul.f32 %v2303_v45, %v2504_v48  ;;  %v2552_v27 = vld [vmem:[%s3633_s5 + $0x60] sm:$0xff] }
 0x10e   :  { %v2305_v49 = vpop.eup %2304  ;;  %v278_v60 = vmul.f32 %v2303_v45, %v2507_v51  ;;  %v47_v45 = vld [vmem:[%s3634_s7] sm:$0xff] }
 0x10f   :  { %1202 = vst [vmem:[%s3632_s9] sm:$0x3f] %v256_v46  ;;  %v257_v52 = vmul.f32 %v2305_v49, %v2301_v29  ;;  %v283_v54 = vmul.f32 %v2305_v49, %v2499_v43  ;;  %v290_v55 = vadd.f32 1.0, %v282_v47  ;;  %v281_v57 = vmul.f32 %v2305_v49, %v2504_v48  ;;  %v2572_v29 = vld [vmem:[%s3633_s5 + $0x70] sm:$0xff] }
 0x110   :  { %v292_v58 = vadd.f32 1.0, %v284_v50  ;;  %v285_v59 = vmul.f32 %v2305_v49, %v2501_v44  ;;  %v279_v62 = vmul.f32 %v2305_v49, %v2507_v51  ;;  %v288_v11 = vadd.f32 1.0, %v280_v56 }
 0x111   :  { %1203 = vst [vmem:[%s3632_s9 + $0x8] sm:$0x3f] %v257_v52  ;;  %v291_v61 = vadd.f32 1.0, %v283_v54  ;;  %v289_v63 = vadd.f32 1.0, %v281_v57  ;;  %v298_v14 = vmul.f32 %v290_v55, %v2402_v5  ;;  %v286_v21 = vadd.f32 1.0, %v278_v60 }
 0x112   :  { %v300_v4 = vmul.f32 %v292_v58, %v2390_v1  ;;  %v293_v8 = vadd.f32 1.0, %v285_v59  ;;  %v287_v19 = vadd.f32 1.0, %v279_v62  ;;  %v296_v23 = vmul.f32 %v288_v11, %v2415_v7  ;;  %v2543_v7 = vpop.permute.xlu0 %304 }
 0x113   :  { %v299_v18 = vmul.f32 %v291_v61, %v2395_v2  ;;  %v297_v22 = vmul.f32 %v289_v63, %v2408_v6  ;;  %v294_v24 = vmul.f32 %v286_v21, %v2430_v10  ;;  %v383_v46 = vrot.slane %v47_v45, %v382_v42 }
 0x114   :  { %v328_v15 = vadd.f32 %v2522_v12, %v300_v4  ;;  %v301_v17 = vmul.f32 %v293_v8, %v2385_v0  ;;  %v326_v0 = vadd.f32 %v2528_v20, %v298_v14  ;;  %v295_v5 = vmul.f32 %v287_v19, %v2424_v9 }
 0x115   :  { %v327_v2 = vadd.f32 %v2528_v20, %v299_v18  ;;  %v325_v6 = vadd.f32 %v2539_v25, %v297_v22  ;;  %v324_v26 = vadd.f32 %v2539_v25, %v296_v23  ;;  %v322_v10 = vadd.f32 %v2543_v7, %v294_v24 }
 0x116   :  { %356 = vrot.lane.b32.xlu0 %v328_v15, %s2323_s11  ;;  %v329_v1 = vadd.f32 %v2522_v12, %v301_v17  ;;  %v323_v9 = vadd.f32 %v2543_v7, %v295_v5  ;;  %v379_v47 = vrot.slane %v47_v45, %v378_v41  ;;  %v2664_v50 = vrot.slane %v383_v46, %v378_v41 }
 0x117   :  { %v441_v11 = vsub.s32 1, %v2657_v40  ;;  %v445_v14 = vsub.s32 5, %v2657_v40 }
 0x118   :  { %340 = vrot.lane.b32.xlu1 %v329_v1, %s2323_s11  ;;  %525 = vmatprep.subr.mxu1 %v329_v1  ;;  %3681 = vst [vmem:[#allocation7_spill] sm:$0xff] %v2664_v50  ;;  %v2666_v52 = vrot.slane %v379_v47, %v378_v41  ;;  %v2698_v41 = vld [vmem:[%s3627_s0 + $0x78] sm:$0xff] }
 0x119   :  { %526 = vmatpush1.msra.mxu1 %v328_v15  ;;  %v442_v22 = vrot.slane %v47_v45, %v441_v11  ;;  %v446_v23 = vrot.slane %v47_v45, %v445_v14  ;;  %v2703_v45 = vld [vmem:[%s3627_s0 + $0x70] sm:$0xff] }
 0x11a   :  { %354 = vrot.lane.b32.xlu0 %v326_v0, %s2323_s11  ;;  %527 = vmatprep.subr.mxu1 %v327_v2  ;;  %3682 = vst [vmem:[#allocation8_spill] sm:$0xff] %v2666_v52 }
 0x11b   :  { %528 = vmatpush1.msra.mxu1 %v326_v0 }
 0x11c   :  { %338 = vrot.lane.b32.xlu1 %v327_v2, %s2323_s11  ;;  %529 = vmatprep.subr.mxu1 %v325_v6 }
 0x11d   :  { %530 = vmatpush1.msra.mxu1 %v324_v26 }
 0x11e   :  { %352 = vrot.lane.b32.xlu0 %v324_v26, %s2323_s11  ;;  %531 = vmatprep.subr.mxu1 %v323_v9 }
 0x11f   :  { %532 = vmatpush1.msra.mxu1 %v322_v10 }
 0x120   :  { %336 = vrot.lane.b32.xlu1 %v325_v6, %s2323_s11  ;;  %2194 = vmatmul.mubr.msk.f32.vlgmr.msra.gmra.mxu1 %vm94_vm0, %v2552_v27 }
 0x121   :  { %571 = vmatprep.mubr.f32.mxu1 %v3641_v3 }
 0x122   :  { %350 = vrot.lane.b32.xlu0 %v322_v10, %s2323_s11 }
 0x124   :  { %334 = vrot.lane.b32.xlu1 %v323_v9, %s2323_s11  ;;  %2195 = vmatmul.mubr.msk.f32.gmra.mxu1 %vm94_vm0, %v2562_v28 }
 0x125   :  { %577 = vmatprep.mubr.f32.mxu1 %v3641_v3 }
 0x126   :  { %416 = vrot.lane.b32.xlu0 %v329_v1, %s2324_s17 }
 0x128   :  { %414 = vrot.lane.b32.xlu1 %v328_v15, %s2324_s17  ;;  %2196 = vmatmul.mubr.msk.f32.gmra.mxu1 %vm94_vm0, %v2572_v29 }
 0x129   :  { %583 = vmatprep.mubr.f32.mxu1 %v3641_v3 }
 0x12a   :  { %412 = vrot.lane.b32.xlu0 %v327_v2, %s2324_s17 }
 0x12c   :  { %410 = vrot.lane.b32.xlu1 %v326_v0, %s2324_s17  ;;  %2197 = vmatmul.mubr.msk.f32.gmra.mxu1 %vm94_vm0, %v2582_v30 }
 0x12d   :  { %589 = vmatprep.mubr.f32.mxu1 %v3641_v3 }
 0x12e   :  { %408 = vrot.lane.b32.xlu0 %v325_v6, %s2324_s17 }
 0x130   :  { %406 = vrot.lane.b32.xlu1 %v324_v26, %s2324_s17  ;;  %2198 = vmatmul.mubr.msk.f32.gmra.mxu1 %vm94_vm0, %v2592_v31 }
 0x131   :  { %595 = vmatprep.mubr.f32.mxu1 %v3641_v3 }
 0x132   :  { %404 = vrot.lane.b32.xlu0 %v323_v9, %s2324_s17  ;;  %v2686_v9 = vrot.slane %v442_v22, %v441_v11 }
 0x134   :  { %402 = vrot.lane.b32.xlu1 %v322_v10, %s2324_s17  ;;  %2199 = vmatmul.mubr.msk.f32.gmra.mxu1 %vm94_vm0, %v2602_v32  ;;  %3683 = vst [vmem:[#allocation9_spill] sm:$0xff] %v2686_v9  ;;  %v2688_v10 = vrot.slane %v446_v23, %v441_v11  ;;  %v2777_v23 = vld [vmem:[%s3633_s5 + $0x18] sm:$0xff] }
 0x135   :  { %601 = vmatprep.mubr.f32.mxu1 %v3641_v3  ;;  %3688 = vst [vmem:[#allocation14_spill] sm:$0xff] %v2777_v23 }
 0x136   :  { %3684 = vst [vmem:[#allocation10_spill] sm:$0xff] %v2688_v10 }
 0x138   :  { %2200 = vmatmul.mubr.msk.f32.gmra.mxu1 %vm94_vm0, %v2612_v33 }
 0x139   :  { %607 = vmatprep.mubr.f32.mxu1 %v3641_v3 }
 0x13c   :  { %2201 = vmatmul.mubr.msk.f32.gmra.mxu1 %vm94_vm0, %v2620_v34 }
 0x13d   :  { %613 = vmatprep.mubr.f32.mxu1 %v3641_v3 }
 0x140   :  { %2202 = vmatmul.mubr.msk.f32.gmra.mxu1 %vm94_vm0, %v2628_v35 }
 0x141   :  { %619 = vmatprep.mubr.f32.mxu1 %v3641_v3 }
 0x144   :  { %2203 = vmatmul.mubr.msk.f32.gmra.mxu1 %vm94_vm0, %v2636_v36 }
 0x145   :  { %625 = vmatprep.mubr.f32.mxu1 %v3641_v3 }
 0x148   :  { %2204 = vmatmul.mubr.msk.f32.gmra.mxu1 %vm94_vm0, %v2644_v37 }
 0x149   :  { %631 = vmatprep.mubr.f32.mxu1 %v3641_v3 }
 0x14c   :  { %2205 = vmatmul.mubr.msk.f32.gmra.mxu1 %vm94_vm0, %v2652_v38 }
 0x14d   :  { %911 = vmatprep.mubr.f32.mxu1 %v3641_v3 }
 0x188   :  { %v357_v49 = vpop.permute.xlu0 %356 }
 0x18a   :  { %v341_v54 = vpop.permute.xlu1 %340 }
 0x18b   :  { %v374_v55 = vsel %vm358_vm2, %v341_v54, %v357_v49  ;;  %v362_v56 = vsel %vm358_vm2, %v357_v49, %v341_v54  ;;  %v2710_v49 = vld [vmem:[%s3627_s0 + $0x68] sm:$0xff] }
 0x18c   :  { %v355_v57 = vpop.permute.xlu0 %354  ;;  %v401_v58 = vmul.f32 %v2664_v50, %v362_v56  ;;  %v400_v59 = vmul.f32 %v2666_v52, %v374_v55 }
 0x18e   :  { %698 = vmatprep.subr.mxu0 %v401_v58  ;;  %v339_v60 = vpop.permute.xlu1 %338  ;;  %v2726_v58 = vld [vmem:[%s3633_s5 + $0x8] sm:$0xff] }
 0x18f   :  { %v361_v61 = vsel %vm358_vm2, %v355_v57, %v339_v60  ;;  %v373_v62 = vsel %vm358_vm2, %v339_v60, %v355_v57  ;;  %699 = vmatpush1.msra.mxu0 %v400_v59  ;;  %v2720_v57 = vld [vmem:[%s3627_s0 + $0x60] sm:$0xff]  ;;  %3686 = vst [vmem:[#allocation12_spill] sm:$0xff] %v2726_v58  ;;  %v2732_v59 = vld [vmem:[%s3627_s0 + $0x58] sm:$0xff] }
 0x190   :  { %v398_v63 = vmul.f32 %v2666_v52, %v373_v62  ;;  %v399_v4 = vmul.f32 %v2664_v50, %v361_v61  ;;  %v353_v8 = vpop.permute.xlu0 %352  ;;  %v2738_v61 = vld [vmem:[%s3627_s0 + $0x50] sm:$0xff] }
 0x191   :  { %v1332_v40 = vmul.f32 %v2738_v61, %v2738_v61 }
 0x192   :  { %700 = vmatprep.subr.mxu0 %v399_v4  ;;  %v337_v15 = vpop.permute.xlu1 %336  ;;  %v2746_v4 = vld [vmem:[%s3627_s0 + $0x48] sm:$0xff] }
 0x193   :  { %v360_v17 = vsel %vm358_vm2, %v353_v8, %v337_v15  ;;  %v372_v18 = vsel %vm358_vm2, %v337_v15, %v353_v8  ;;  %701 = vmatpush1.msra.mxu0 %v398_v63  ;;  %v2756_v15 = vld [vmem:[%s3627_s0 + $0x40] sm:$0xff] }
 0x194   :  { %v396_v19 = vmul.f32 %v2666_v52, %v372_v18  ;;  %v397_v21 = vmul.f32 %v2664_v50, %v360_v17  ;;  %v351_v1 = vpop.permute.xlu0 %350  ;;  %v2762_v17 = vld [vmem:[%s3633_s5 + $0x10] sm:$0xff] }
 0x195   :  { %3687 = vst [vmem:[#allocation13_spill] sm:$0xff] %v2762_v17 }
 0x196   :  { %702 = vmatprep.subr.mxu0 %v397_v21  ;;  %v335_v0 = vpop.permute.xlu1 %334 }
 0x197   :  { %v359_v2 = vsel %vm358_vm2, %v351_v1, %v335_v0  ;;  %v371_v5 = vsel %vm358_vm2, %v335_v0, %v351_v1  ;;  %703 = vmatpush1.msra.mxu0 %v396_v19 }
 0x198   :  { %v394_v24 = vmul.f32 %v2666_v52, %v371_v5  ;;  %v395_v6 = vmul.f32 %v2664_v50, %v359_v2  ;;  %v417_v26 = vpop.permute.xlu0 %416  ;;  %v1337_v50 = vmul.f32 %v2698_v41, %v2698_v41 }
 0x19a   :  { %704 = vmatprep.subr.mxu0 %v395_v6  ;;  %v415_v42 = vpop.permute.xlu1 %414 }
 0x19b   :  { %v422_v46 = vsel %vm418_vm3, %v415_v42, %v417_v26  ;;  %v438_v47 = vsel %vm418_vm3, %v417_v26, %v415_v42  ;;  %705 = vmatpush1.msra.mxu0 %v394_v24  ;;  %v2789_v42 = vld [vmem:[%s3633_s5 + $0x20] sm:$0xff] }
 0x19c   :  { %v463_v54 = vmul.f32 %v2686_v9, %v422_v46  ;;  %v464_v55 = vmul.f32 %v2688_v10, %v438_v47  ;;  %v413_v56 = vpop.permute.xlu0 %412  ;;  %2206 = vmatmul.mubr.msk.f32.vlgmr.msra.gmra.mxu0 %vm94_vm0, %v2693_v39  ;;  %1277 = vmatprep.subr.mxu0 %v2698_v41  ;;  %3689 = vst [vmem:[#allocation15_spill] sm:$0xff] %v2789_v42  ;;  %v2794_v46 = vld [vmem:[%s3633_s5 + $0xc0] sm:$0xff]  ;;  %v2805_v47 = vld [vmem:[%s3633_s5 + $0x28] sm:$0xff] }
 0x19d   :  { %744 = vmatprep.mubr.f32.mxu0 %v3641_v3  ;;  %1278 = vmatpush1.msra.mxu0 %v2703_v45  ;;  %3690 = vst [vmem:[#allocation16_spill] sm:$0xff] %v2794_v46  ;;  %3691 = vst [vmem:[#allocation17_spill] sm:$0xff] %v2805_v47  ;;  %v1336_v39 = vmul.f32 %v2703_v45, %v2703_v45 }
 0x19e   :  { %v411_v60 = vpop.permute.xlu1 %410  ;;  %871 = vmatprep.subr.mxu1 %v464_v55  ;;  %1279 = vmatprep.subr.mxu0 %v2710_v49  ;;  %v2821_v55 = vld [vmem:[%s3633_s5 + $0x30] sm:$0xff] }
 0x19f   :  { %v421_v62 = vsel %vm418_vm3, %v411_v60, %v413_v56  ;;  %v437_v63 = vsel %vm418_vm3, %v413_v56, %v411_v60  ;;  %872 = vmatpush1.msra.mxu1 %v463_v54  ;;  %1280 = vmatpush1.msra.mxu0 %v2720_v57  ;;  %v2810_v54 = vld [vmem:[%s3633_s5 + $0xc8] sm:$0xff]  ;;  %3693 = vst [vmem:[#allocation19_spill] sm:$0xff] %v2821_v55  ;;  %v2826_v56 = vld [vmem:[%s3633_s5 + $0xd0] sm:$0xff]  ;;  %v2837_v60 = vld [vmem:[%s3633_s5 + $0x38] sm:$0xff] }
 0x1a0   :  { %v461_v8 = vmul.f32 %v2686_v9, %v421_v62  ;;  %v462_v11 = vmul.f32 %v2688_v10, %v437_v63  ;;  %v409_v14 = vpop.permute.xlu0 %408  ;;  %2207 = vmatmul.mubr.msk.f32.gmra.mxu0 %vm94_vm0, %v2726_v58  ;;  %1281 = vmatprep.subr.mxu0 %v2732_v59  ;;  %3692 = vst [vmem:[#allocation18_spill] sm:$0xff] %v2810_v54  ;;  %3694 = vst [vmem:[#allocation20_spill] sm:$0xff] %v2826_v56  ;;  %v2842_v62 = vld [vmem:[%s3633_s5 + $0xd8] sm:$0xff]  ;;  %v2853_v63 = vld [vmem:[%s3633_s5 + $0x40] sm:$0xff] }
 0x1a1   :  { %750 = vmatprep.mubr.f32.mxu0 %v3641_v3  ;;  %1282 = vmatpush1.msra.mxu0 %v2738_v61  ;;  %3695 = vst [vmem:[#allocation21_spill] sm:$0xff] %v2837_v60  ;;  %3696 = vst [vmem:[#allocation22_spill] sm:$0xff] %v2842_v62 }
 0x1a2   :  { %v407_v18 = vpop.permute.xlu1 %406  ;;  %873 = vmatprep.subr.mxu1 %v462_v11  ;;  %1283 = vmatprep.subr.mxu0 %v2746_v4  ;;  %3697 = vst [vmem:[#allocation23_spill] sm:$0xff] %v2853_v63  ;;  %v2869_v11 = vld [vmem:[%s3633_s5 + $0x48] sm:$0xff] }
 0x1a3   :  { %v420_v19 = vsel %vm418_vm3, %v407_v18, %v409_v14  ;;  %v436_v21 = vsel %vm418_vm3, %v409_v14, %v407_v18  ;;  %874 = vmatpush1.msra.mxu1 %v461_v8  ;;  %1284 = vmatpush1.msra.mxu0 %v2756_v15  ;;  %v2858_v8 = vld [vmem:[%s3633_s5 + $0xe0] sm:$0xff]  ;;  %3699 = vst [vmem:[#allocation25_spill] sm:$0xff] %v2869_v11  ;;  %v2874_v14 = vld [vmem:[%s3633_s5 + $0xe8] sm:$0xff]  ;;  %v2885_v18 = vld [vmem:[%s3633_s5 + $0x50] sm:$0xff] }
 0x1a4   :  { %v459_v1 = vmul.f32 %v2686_v9, %v420_v19  ;;  %v460_v22 = vmul.f32 %v2688_v10, %v436_v21  ;;  %2208 = vmatmul.mubr.msk.f32.gmra.mxu0 %vm94_vm0, %v2762_v17  ;;  %v405_v0 = vpop.permute.xlu0 %404  ;;  %3698 = vst [vmem:[#allocation24_spill] sm:$0xff] %v2858_v8  ;;  %3700 = vst [vmem:[#allocation26_spill] sm:$0xff] %v2874_v14  ;;  %v2890_v19 = vld [vmem:[%s3633_s5 + $0xf0] sm:$0xff]  ;;  %v59_v21 = vld [vmem:[%s3633_s5 + $0x58] sm:$0xff] }
 0x1a5   :  { %756 = vmatprep.mubr.f32.mxu0 %v3641_v3  ;;  %3701 = vst [vmem:[#allocation27_spill] sm:$0xff] %v2885_v18  ;;  %3702 = vst [vmem:[#allocation28_spill] sm:$0xff] %v2890_v19 }
 0x1a6   :  { %v403_v2 = vpop.permute.xlu1 %402  ;;  %875 = vmatprep.subr.mxu1 %v460_v22  ;;  %v2914_v22 = vld [vmem:[%s3633_s5 + $0x100] sm:$0xff] }
 0x1a7   :  { %v419_v5 = vsel %vm418_vm3, %v403_v2, %v405_v0  ;;  %v435_v24 = vsel %vm418_vm3, %v405_v0, %v403_v2  ;;  %876 = vmatpush1.msra.mxu1 %v459_v1  ;;  %v2904_v1 = vld [vmem:[%s3633_s5 + $0xf8] sm:$0xff]  ;;  %3704 = vst [vmem:[#allocation30_spill] sm:$0xff] %v2914_v22  ;;  %v2925_v0 = vld [vmem:[%s3633_s5 + $0x108] sm:$0xff] }
 0x1a8   :  { %v457_v6 = vmul.f32 %v2686_v9, %v419_v5  ;;  %v458_v26 = vmul.f32 %v2688_v10, %v435_v24  ;;  %2209 = vmatmul.mubr.msk.f32.gmra.mxu0 %vm94_vm0, %v2777_v23  ;;  %3703 = vst [vmem:[#allocation29_spill] sm:$0xff] %v2904_v1  ;;  %3705 = vst [vmem:[#allocation31_spill] sm:$0xff] %v2925_v0  ;;  %v2191_v2 = vld [vmem:[%s3633_s5 + $0x118] sm:$0xff] }
 0x1a9   :  { %762 = vmatprep.mubr.f32.mxu0 %v3641_v3 }
 0x1aa   :  { %877 = vmatprep.subr.mxu1 %v458_v26 }
 0x1ab   :  { %878 = vmatpush1.msra.mxu1 %v457_v6 }
 0x1ac   :  { %2210 = vmatmul.mubr.msk.f32.gmra.mxu0 %vm94_vm0, %v2789_v42  ;;  %2218 = vmatmul.mubr.msk.f32.vlgmr.msra.gmra.mxu1 %vm94_vm0, %v2794_v46 }
 0x1ad   :  { %768 = vmatprep.mubr.f32.mxu0 %v3641_v3  ;;  %917 = vmatprep.mubr.f32.mxu1 %v3641_v3 }
 0x1b0   :  { %2211 = vmatmul.mubr.msk.f32.gmra.mxu0 %vm94_vm0, %v2805_v47  ;;  %2219 = vmatmul.mubr.msk.f32.gmra.mxu1 %vm94_vm0, %v2810_v54  ;;  %v1333_v47 = vmul.f32 %v2732_v59, %v2732_v59  ;;  %v1335_v54 = vmul.f32 %v2710_v49, %v2710_v49 }
 0x1b1   :  { %774 = vmatprep.mubr.f32.mxu0 %v3641_v3  ;;  %923 = vmatprep.mubr.f32.mxu1 %v3641_v3 }
 0x1b4   :  { %2212 = vmatmul.mubr.msk.f32.gmra.mxu0 %vm94_vm0, %v2821_v55  ;;  %2220 = vmatmul.mubr.msk.f32.gmra.mxu1 %vm94_vm0, %v2826_v56  ;;  %v1334_v56 = vmul.f32 %v2720_v57, %v2720_v57 }
 0x1b5   :  { %780 = vmatprep.mubr.f32.mxu0 %v3641_v3  ;;  %929 = vmatprep.mubr.f32.mxu1 %v3641_v3 }
 0x1b8   :  { %2213 = vmatmul.mubr.msk.f32.gmra.mxu0 %vm94_vm0, %v2837_v60  ;;  %2221 = vmatmul.mubr.msk.f32.gmra.mxu1 %vm94_vm0, %v2842_v62  ;;  %v1331_v62 = vmul.f32 %v2746_v4, %v2746_v4 }
 0x1b9   :  { %786 = vmatprep.mubr.f32.mxu0 %v3641_v3  ;;  %935 = vmatprep.mubr.f32.mxu1 %v3641_v3 }
 0x1ba   :  { %v1347_v17 = vadd.f32 %v1333_v47, %v1331_v62 }
 0x1bc   :  { %2214 = vmatmul.mubr.msk.f32.gmra.mxu0 %vm94_vm0, %v2853_v63  ;;  %2222 = vmatmul.mubr.msk.f32.gmra.mxu1 %vm94_vm0, %v2858_v8  ;;  %v1330_v8 = vmul.f32 %v2756_v15, %v2756_v15  ;;  %v1348_v52 = vadd.f32 %v1347_v17, %v1335_v54 }
 0x1bd   :  { %792 = vmatprep.mubr.f32.mxu0 %v3641_v3  ;;  %941 = vmatprep.mubr.f32.mxu1 %v3641_v3 }
 0x1be   :  { %v1338_v23 = vadd.f32 %v1332_v40, %v1330_v8  ;;  %v1349_v62 = vadd.f32 %v1348_v52, %v1337_v50 }
 0x1c0   :  { %2215 = vmatmul.mubr.msk.f32.gmra.mxu0 %vm94_vm0, %v2869_v11  ;;  %2223 = vmatmul.mubr.msk.f32.gmra.mxu1 %vm94_vm0, %v2874_v14  ;;  %v1339_v10 = vadd.f32 %v1338_v23, %v1334_v56  ;;  %v1350_v56 = vrot.slane %v1349_v62, 4 }
 0x1c1   :  { %798 = vmatprep.mubr.f32.mxu0 %v3641_v3  ;;  %947 = vmatprep.mubr.f32.mxu1 %v3641_v3 }
 0x1c2   :  { %v1340_v8 = vadd.f32 %v1339_v10, %v1336_v39  ;;  %v1351_v10 = vadd.f32 %v1350_v56, %v1349_v62 }
 0x1c4   :  { %2216 = vmatmul.mubr.msk.f32.gmra.mxu0 %vm94_vm0, %v2885_v18  ;;  %2224 = vmatmul.mubr.msk.f32.gmra.mxu1 %vm94_vm0, %v2890_v19  ;;  %v1341_v38 = vrot.slane %v1340_v8, 4 }
 0x1c5   :  { %804 = vmatprep.mubr.f32.mxu0 %v3641_v3  ;;  %953 = vmatprep.mubr.f32.mxu1 %v3641_v3 }
 0x1c6   :  { %v1342_v17 = vadd.f32 %v1341_v38, %v1340_v8 }
 0x1c8   :  { %2217 = vmatmul.mubr.msk.f32.gmra.mxu0 %vm94_vm0, %v59_v21  ;;  %2225 = vmatmul.mubr.msk.f32.gmra.mxu1 %vm94_vm0, %v2904_v1  ;;  %v1343_v50 = vrot.slane %v1342_v17, 2 }
 0x1c9   :  { %959 = vmatprep.mubr.f32.mxu1 %v3641_v3  ;;  %1317 = vmatprep.mubr.f32.mxu0 %v3641_v3 }
 0x1cc   :  { %2226 = vmatmul.mubr.msk.f32.gmra.mxu1 %vm94_vm0, %v2914_v22  ;;  %2238 = vmatmul.mubr.msk.f32.vlgmr.msra.gmra.mxu0 %vm94_vm0, %v2442_v13  ;;  %v2935_v13 = vld [vmem:[%s3633_s5 + $0x110] sm:$0xff] }
 0x1cd   :  { %965 = vmatprep.mubr.f32.mxu1 %v3641_v3  ;;  %1323 = vmatprep.mubr.f32.mxu0 %v3641_v3  ;;  %3706 = vst [vmem:[#allocation32_spill] sm:$0xff] %v2935_v13 }
 0x1d0   :  { %2227 = vmatmul.mubr.msk.f32.gmra.mxu1 %vm94_vm0, %v2925_v0  ;;  %2239 = vmatmul.mubr.msk.f32.gmra.mxu0 %vm94_vm0, %v2458_v16 }
 0x1d1   :  { %971 = vmatprep.mubr.f32.mxu1 %v3641_v3  ;;  %1596 = vmatprep.mubr.f32.mxu0 %v3641_v3 }
 0x1d4   :  { %2228 = vmatmul.mubr.msk.f32.gmra.mxu1 %vm94_vm0, %v2935_v13 }
 0x1d5   :  { %977 = vmatprep.mubr.f32.mxu1 %v3641_v3 }
 0x1d8   :  { %2229 = vmatmul.mubr.msk.f32.gmra.mxu1 %vm94_vm0, %v2191_v2 }
 0x1d9   :  { %1733 = vmatprep.mubr.f32.mxu1 %v3641_v3 }
 0x1e0   :  { %v2946_v16 = vpop.f32.mrf.mxu1 }
 0x1e1   :  { %3707 = vst [vmem:[#allocation33_spill] sm:$0xff] %v2946_v16 }
 0x1e2   :  { %v2948_v5 = vpop.f32.mrf.mxu1 }
 0x1e4   :  { %v2950_v24 = vpop.f32.mrf.mxu1 }
 0x1e5   :  { %3708 = vst [vmem:[#allocation34_spill] sm:$0xff] %v2950_v24 }
 0x1e6   :  { %v2952_v6 = vpop.f32.mrf.mxu1 }
 0x1e8   :  { %v2954_v26 = vpop.f32.mrf.mxu1 }
 0x1e9   :  { %3709 = vst [vmem:[#allocation35_spill] sm:$0xff] %v2954_v26 }
 0x1ea   :  { %v2956_v21 = vpop.f32.mrf.mxu1 }
 0x1ec   :  { %v585_v13 = vpop.f32.mrf.mxu1 }
 0x1ee   :  { %v2958_v0 = vpop.f32.mrf.mxu1 }
 0x1ef   :  { %3710 = vst [vmem:[#allocation36_spill] sm:$0xff] %v2958_v0 }
 0x1f0   :  { %v2960_v18 = vpop.f32.mrf.mxu1 }
 0x1f2   :  { %v2962_v2 = vpop.f32.mrf.mxu1 }
 0x1f4   :  { %v2964_v3 = vpop.f32.mrf.mxu1 }
 0x1f6   :  { %v2966_v22 = vpop.f32.mrf.mxu1 }
 0x1f8   :  { %v2968_v11 = vpop.f32.mrf.mxu1 }
 0x1fa   :  { %v2970_v1 = vpop.f32.mrf.mxu1 }
 0x1fc   :  { %v2972_v63 = vpop.f32.mrf.mxu1 }
 0x1fe   :  { %v2974_v19 = vpop.f32.mrf.mxu1 }
 0x200   :  { %v2976_v60 = vpop.f32.mrf.mxu1 }
 0x201   :  { %3711 = vst [vmem:[#allocation37_spill] sm:$0xff] %v2976_v60 }
 0x202   :  { %v2978_v14 = vpop.f32.mrf.mxu1 }
 0x203   :  { %3712 = vst [vmem:[#allocation38_spill] sm:$0xff] %v2978_v14 }
 0x204   :  { %v2980_v55 = vpop.f32.mrf.mxu1 }
 0x205   :  { %3713 = vst [vmem:[#allocation39_spill] sm:$0xff] %v2980_v55 }
 0x206   :  { %v2990_v42 = vpop.f32.mrf.mxu1 }
 0x207   :  { %3714 = vst [vmem:[#allocation40_spill] sm:$0xff] %v2990_v42 }
 0x208   :  { %v2998_v58 = vpop.f32.mrf.mxu1 }
 0x209   :  { %3716 = vst [vmem:[#allocation42_spill] sm:$0xff] %v2998_v58 }
 0x20a   :  { %v3008_v40 = vpop.f32.mrf.mxu1 }
 0x20b   :  { %3718 = vst [vmem:[#allocation44_spill] sm:$0xff] %v3008_v40 }
 0x20c   :  { %v3014_v58 = vpop.f32.mrf.mxu1 }
 0x20d   :  { %3720 = vst [vmem:[#allocation46_spill] sm:$0xff] %v3014_v58  ;;  %v1352_v58 = vrot.slane %v1351_v10, 2 }
 0x20e   :  { %v3018_v60 = vpop.f32.mrf.mxu1 }
 0x20f   :  { %3722 = vst [vmem:[#allocation48_spill] sm:$0xff] %v3018_v60  ;;  %v1353_v38 = vadd.f32 %v1352_v58, %v1351_v10 }
 0x25c   :  { %v2996_v46 = vpop.f32.mrf.mxu0 }
 0x25d   :  { %3715 = vst [vmem:[#allocation41_spill] sm:$0xff] %v2996_v46 }
 0x25e   :  { %v3002_v9 = vpop.f32.mrf.mxu0 }
 0x260   :  { %v3006_v42 = vpop.f32.mrf.mxu0 }
 0x261   :  { %3717 = vst [vmem:[#allocation43_spill] sm:$0xff] %v3006_v42  ;;  %v1344_v42 = vadd.f32 %v1343_v50, %v1342_v17 }
 0x262   :  { %v3010_v47 = vpop.f32.mrf.mxu0 }
 0x263   :  { %v1345_v8 = vrot.slane %v1344_v42, 1 }
 0x264   :  { %v3012_v55 = vpop.f32.mrf.mxu0 }
 0x265   :  { %3719 = vst [vmem:[#allocation45_spill] sm:$0xff] %v3012_v55  ;;  %v1346_v16 = vadd.f32 %v1345_v8, %v1344_v42 }
 0x266   :  { %v3016_v23 = vpop.f32.mrf.mxu0 }
 0x267   :  { %3721 = vst [vmem:[#allocation47_spill] sm:$0xff] %v3016_v23  ;;  %v1356_v0 = vmax.f32 %v1346_v16, 1e-24 }
 0x268   :  { %v758_v14 = vpop.f32.mrf.mxu0 }
 0x269   :  { %v3020_v54 = vadd.f32 %v758_v14, %v585_v13  ;;  %2306 = vrsqrt.f32 %v1356_v0 }
 0x26a   :  { %v3022_v37 = vpop.f32.mrf.mxu0 }
 0x26b   :  { %3723 = vst [vmem:[#allocation49_spill] sm:$0xff] %v3020_v54  ;;  %3724 = vst [vmem:[#allocation50_spill] sm:$0xff] %v3022_v37  ;;  %v1354_v54 = vrot.slane %v1353_v38, 1 }
 0x26c   :  { %v764_v39 = vpop.f32.mrf.mxu0  ;;  %v3024_v40 = vpop.f32.mrf.mxu1 }
 0x26d   :  { %3725 = vst [vmem:[#allocation51_spill] sm:$0xff] %v3024_v40  ;;  %v765_v17 = vadd.f32 %v764_v39, %v2960_v18  ;;  %v1355_v50 = vadd.f32 %v1354_v54, %v1353_v38 }
 0x26e   :  { %v766_v52 = vpop.f32.mrf.mxu0  ;;  %v3026_v55 = vpop.f32.mrf.mxu1 }
 0x26f   :  { %v767_v10 = vadd.f32 %v766_v52, %v2962_v2  ;;  %v1357_v8 = vmax.f32 %v1355_v50, 1e-24 }
 0x270   :  { %v770_v26 = vpop.f32.mrf.mxu0  ;;  %v3028_v36 = vpop.f32.mrf.mxu1 }
 0x271   :  { %3726 = vst [vmem:[#allocation52_spill] sm:$0xff] %v3028_v36  ;;  %2308 = vrsqrt.f32 %v1357_v8 }
 0x272   :  { %v772_v24 = vpop.f32.mrf.mxu0  ;;  %v3030_v60 = vpop.f32.mrf.mxu1 }
 0x273   :  { %v773_v54 = vadd.f32 %v772_v24, %v2966_v22 }
 0x274   :  { %v776_v14 = vpop.f32.mrf.mxu0  ;;  %v3032_v13 = vpop.f32.mrf.mxu1 }
 0x275   :  { %3727 = vst [vmem:[#allocation53_spill] sm:$0xff] %v3032_v13  ;;  %v777_v16 = vadd.f32 %v776_v14, %v2968_v11 }
 0x276   :  { %v778_v62 = vpop.f32.mrf.mxu0  ;;  %v3034_v56 = vpop.f32.mrf.mxu1 }
 0x277   :  { %3728 = vst [vmem:[#allocation54_spill] sm:$0xff] %v3034_v56 }
 0x278   :  { %v782_v40 = vpop.f32.mrf.mxu0  ;;  %v3036_v46 = vpop.f32.mrf.mxu1 }
 0x279   :  { %3729 = vst [vmem:[#allocation55_spill] sm:$0xff] %v3036_v46  ;;  %v771_v46 = vadd.f32 %v770_v26, %v2964_v3  ;;  %v783_v22 = vadd.f32 %v782_v40, %v2972_v63 }
 0x27a   :  { %v784_v35 = vpop.f32.mrf.mxu0  ;;  %v3038_v37 = vpop.f32.mrf.mxu1 }
 0x27b   :  { %3730 = vst [vmem:[#allocation56_spill] sm:$0xff] %v3038_v37  ;;  %v785_v14 = vadd.f32 %v784_v35, %v2974_v19 }
 0x27c   :  { %v3041_v36 = vpop.f32.mrf.mxu0  ;;  %v937_v58 = vpop.f32.mrf.mxu1 }
 0x27d   :  { %v3044_v13 = vadd.f32 %v937_v58, %v765_v17 }
 0x27e   :  { %v3046_v56 = vpop.f32.mrf.mxu0  ;;  %v939_v23 = vpop.f32.mrf.mxu1 }
 0x27f   :  { %v3049_v42 = vadd.f32 %v939_v23, %v767_v10  ;;  %v779_v23 = vadd.f32 %v778_v62, %v2970_v1 }
 0x280   :  { %v3051_v37 = vpop.f32.mrf.mxu0  ;;  %v943_v18 = vpop.f32.mrf.mxu1 }
 0x281   :  { %3731 = vst [vmem:[#allocation57_spill] sm:$0xff] %v3049_v42  ;;  %v3054_v39 = vadd.f32 %v943_v18, %v771_v46  ;;  %v2307_v18 = vpop.eup %2306 }
 0x282   :  { %v3056_v2 = vpop.f32.mrf.mxu0  ;;  %v945_v52 = vpop.f32.mrf.mxu1 }
 0x283   :  { %3732 = vst [vmem:[#allocation58_spill] sm:$0xff] %v3054_v39  ;;  %v3059_v38 = vadd.f32 %v945_v52, %v773_v54  ;;  %v2309_v52 = vpop.eup %2308 }
 0x284   :  { %v3061_v3 = vpop.f32.mrf.mxu0  ;;  %v949_v26 = vpop.f32.mrf.mxu1 }
 0x285   :  { %3733 = vst [vmem:[#allocation59_spill] sm:$0xff] %v3059_v38  ;;  %v3064_v17 = vadd.f32 %v949_v26, %v777_v16 }
 0x286   :  { %v3066_v50 = vpop.f32.mrf.mxu0  ;;  %v951_v46 = vpop.f32.mrf.mxu1 }
 0x287   :  { %3734 = vst [vmem:[#allocation60_spill] sm:$0xff] %v3064_v17  ;;  %v3069_v0 = vadd.f32 %v951_v46, %v779_v23 }
 0x288   :  { %v3071_v24 = vpop.f32.mrf.mxu0  ;;  %v955_v11 = vpop.f32.mrf.mxu1 }
 0x289   :  { %3735 = vst [vmem:[#allocation61_spill] sm:$0xff] %v3069_v0  ;;  %v3074_v58 = vadd.f32 %v955_v11, %v783_v22 }
 0x28a   :  { %v3076_v10 = vpop.f32.mrf.mxu0  ;;  %v957_v8 = vpop.f32.mrf.mxu1 }
 0x28b   :  { %3736 = vst [vmem:[#allocation62_spill] sm:$0xff] %v3074_v58  ;;  %v3078_v1 = vadd.f32 %v957_v8, %v785_v14 }
 0x28c   :  { %v1319_v62 = vpop.f32.mrf.mxu0 }
 0x28d   :  { %3737 = vst [vmem:[#allocation63_spill] sm:$0xff] %v3078_v1  ;;  %v1360_v63 = vadd.f32 %v1319_v62, %v2491_v53 }
 0x28e   :  { %v1321_v54 = vpop.f32.mrf.mxu0 }
 0x28f   :  { %v1361_v23 = vadd.f32 %v1321_v54, %v2491_v53 }
 0x290   :  { %v1325_v16 = vpop.f32.mrf.mxu0 }
 0x291   :  { %v1362_v40 = vmul.f32 %v2307_v18, %v1325_v16 }
 0x292   :  { %v1327_v26 = vpop.f32.mrf.mxu0 }
 0x293   :  { %v1364_v46 = vadd.f32 %v1362_v40, %v1360_v63  ;;  %v1363_v35 = vmul.f32 %v2309_v52, %v1327_v26 }
 0x295   :  { %v1366_v19 = vsel %vm219_vm1, %v1364_v46, -inf  ;;  %v1365_v22 = vadd.f32 %v1363_v35, %v1361_v23 }
 0x296   :  { %v1367_v11 = vrot.slane %v1366_v19, 4 }
 0x297   :  { %v1373_v14 = vsel %vm219_vm1, %v1365_v22, -inf }
 0x298   :  { %v1368_v8 = vmax.f32 %v1366_v19, %v1367_v11  ;;  %v1374_v1 = vrot.slane %v1373_v14, 4 }
 0x29a   :  { %v1369_v0 = vrot.slane %v1368_v8, 2  ;;  %v1375_v58 = vmax.f32 %v1373_v14, %v1374_v1 }
 0x29c   :  { %v1370_v17 = vmax.f32 %v1368_v8, %v1369_v0  ;;  %v1376_v42 = vrot.slane %v1375_v58, 2 }
 0x29e   :  { %v1371_v38 = vrot.slane %v1370_v17, 1  ;;  %v1377_v62 = vmax.f32 %v1375_v58, %v1376_v42 }
 0x2a0   :  { %v1372_v18 = vmax.f32 %v1370_v17, %v1371_v38  ;;  %v1378_v16 = vrot.slane %v1377_v62, 1 }
 0x2a2   :  { %v1380_v39 = vsub.f32 %v1364_v46, %v1372_v18  ;;  %v1379_v53 = vmax.f32 %v1377_v62, %v1378_v16 }
 0x2a4   :  { %v1382_v54 = vmul.f32 1.442695, %v1380_v39  ;;  %v1381_v52 = vsub.f32 %v1365_v22, %v1379_v53 }
 0x2a6   :  { %2310 = vpow2.f32 %v1382_v54  ;;  %v1384_v63 = vmul.f32 1.442695, %v1381_v52 }
 0x2a8   :  { %2312 = vpow2.f32 %v1384_v63 }
 0x2b3   :  { %v2311_v40 = vpop.eup %2310 }
 0x2b4   :  { %v1386_v26 = vsel %vm219_vm1, %v2311_v40, 0.0 }
 0x2b5   :  { %v2313_v23 = vpop.eup %2312  ;;  %v1387_v35 = vrot.slane %v1386_v26, 4 }
 0x2b6   :  { %v1393_v1 = vsel %vm219_vm1, %v2313_v23, 0.0 }
 0x2b7   :  { %v1388_v0 = vadd.f32 %v1387_v35, %v1386_v26  ;;  %v1394_v19 = vrot.slane %v1393_v1, 4 }
 0x2b9   :  { %v1389_v11 = vrot.slane %v1388_v0, 2  ;;  %v1395_v42 = vadd.f32 %v1394_v19, %v1393_v1 }
 0x2bb   :  { %v1390_v38 = vadd.f32 %v1389_v11, %v1388_v0  ;;  %v1396_v17 = vrot.slane %v1395_v42, 2 }
 0x2bd   :  { %v1391_v58 = vrot.slane %v1390_v38, 1  ;;  %v1397_v46 = vadd.f32 %v1396_v17, %v1395_v42 }
 0x2bf   :  { %v1392_v39 = vadd.f32 %v1391_v58, %v1390_v38  ;;  %v1398_v22 = vrot.slane %v1397_v46, 1 }
 0x2c1   :  { %2314 = vrcp.f32 %v1392_v39  ;;  %v1399_v14 = vadd.f32 %v1398_v22, %v1397_v46 }
 0x2c3   :  { %2316 = vrcp.f32 %v1399_v14 }
 0x2ce   :  { %v2315_v8 = vpop.eup %2314 }
 0x2cf   :  { %v1402_v62 = vmul.f32 %v2315_v8, %v2311_v40  ;;  %v1410_v18 = vmul.f32 %v2315_v8, %v2501_v44  ;;  %v1408_v16 = vmul.f32 %v2315_v8, %v2499_v43  ;;  %v1406_v54 = vmul.f32 %v2315_v8, %v2504_v48 }
 0x2d0   :  { %v2317_v53 = vpop.eup %2316  ;;  %v1404_v42 = vmul.f32 %v2315_v8, %v2507_v51 }
 0x2d1   :  { %2284 = vst [vmem:[%s3632_s9 + $0x10] sm:$0x3f] %v1402_v62  ;;  %v1403_v52 = vmul.f32 %v2317_v53, %v2313_v23  ;;  %v1418_v63 = vadd.f32 1.0, %v1410_v18  ;;  %v1411_v26 = vmul.f32 %v2317_v53, %v2501_v44  ;;  %v1416_v35 = vadd.f32 1.0, %v1408_v16  ;;  %v3744_v16 = vld [vmem:[#allocation2_spill] sm:$0xff] }
 0x2d2   :  { %v1409_v1 = vmul.f32 %v2317_v53, %v2499_v43  ;;  %v1407_v40 = vmul.f32 %v2317_v53, %v2504_v48  ;;  %v1405_v0 = vmul.f32 %v2317_v53, %v2507_v51  ;;  %v1414_v48 = vadd.f32 1.0, %v1406_v54 }
 0x2d3   :  { %2285 = vst [vmem:[%s3632_s9 + $0x18] sm:$0x3f] %v1403_v52  ;;  %v1426_v19 = vmul.f32 %v2703_v45, %v1418_v63  ;;  %v1419_v11 = vadd.f32 1.0, %v1411_v26  ;;  %v1424_v43 = vmul.f32 %v2720_v57, %v1416_v35  ;;  %v1412_v39 = vadd.f32 1.0, %v1404_v42  ;;  %v3747_v52 = vld [vmem:[#allocation34_spill] sm:$0xff]  ;;  %v3748_v63 = vld [vmem:[#allocation43_spill] sm:$0xff] }
 0x2d4   :  { %v1417_v23 = vadd.f32 1.0, %v1409_v1  ;;  %v1415_v38 = vadd.f32 1.0, %v1407_v40  ;;  %v1413_v46 = vadd.f32 1.0, %v1405_v0  ;;  %v747_v26 = vadd.f32 %v3748_v63, %v3747_v52  ;;  %v3749_v35 = vld [vmem:[#allocation51_spill] sm:$0xff]  ;;  %v3750_v40 = vld [vmem:[#allocation52_spill] sm:$0xff]  ;;  %v3753_v42 = vld [vmem:[#allocation45_spill] sm:$0xff] }
 0x2d5   :  { %v1434_v44 = vadd.f32 %v1426_v19, %v2522_v12  ;;  %v1427_v17 = vmul.f32 %v2698_v41, %v1419_v11  ;;  %v1432_v22 = vadd.f32 %v1424_v43, %v2528_v20  ;;  %v1422_v41 = vmul.f32 %v2738_v61, %v1414_v48  ;;  %v3751_v19 = vld [vmem:[#allocation3_spill] sm:$0xff]  ;;  %v3755_v43 = vld [vmem:[#allocation49_spill] sm:$0xff] }
 0x2d6   :  { %v1425_v58 = vmul.f32 %v2710_v49, %v1417_v23  ;;  %v1423_v51 = vmul.f32 %v2732_v59, %v1415_v38  ;;  %v1421_v49 = vmul.f32 %v2746_v4, %v1413_v46  ;;  %v1420_v14 = vmul.f32 %v2756_v15, %v1412_v39  ;;  %v3752_v11 = vld [vmem:[#allocation35_spill] sm:$0xff]  ;;  %v3757_v46 = vld [vmem:[#allocation4_spill] sm:$0xff] }
 0x2d7   :  { %1500 = vrot.lane.b32.xlu1 %v1434_v44, %s2324_s17  ;;  %1462 = vrot.lane.b32.xlu0 %v1434_v44, %s2323_s11  ;;  %v1435_v45 = vadd.f32 %v1427_v17, %v2522_v12  ;;  %v1430_v59 = vadd.f32 %v1422_v41, %v2539_v25  ;;  %v3738_v4 = vmov 0.0   ;;  %v986_v0 = vadd.f32 %v3750_v40, %v747_v26  ;;  %v3756_v48 = vld [vmem:[#allocation55_spill] sm:$0xff] }
 0x2d8   :  { %v1433_v57 = vadd.f32 %v1425_v58, %v2528_v20  ;;  %v1431_v12 = vadd.f32 %v1423_v51, %v2539_v25  ;;  %v1429_v61 = vadd.f32 %v1421_v49, %v2543_v7  ;;  %v1428_v20 = vadd.f32 %v1420_v14, %v2543_v7  ;;  %v43_v25 = vld [vmem:[%s3635_s6] sm:$0xff]  ;;  %v44_v7 = vld [vmem:[%s3635_s6 + $0x8] sm:$0xff]  ;;  %v3760_v14 = vld [vmem:[#allocation5_spill] sm:$0xff] }
 0x2d9   :  { %1556 = vmatprep.subr.mxu0 %v1435_v45  ;;  %v753_v23 = vadd.f32 %v3753_v42, %v3752_v11  ;;  %v990_v58 = vadd.f32 %v3756_v48, %v3755_v43  ;;  %v3770_v42 = vld [vmem:[#allocation10_spill] sm:$0xff] }
 0x2da   :  { %1557 = vmatpush1.msra.mxu0 %v1434_v44  ;;  %v3754_v44 = vld [vmem:[#allocation53_spill] sm:$0xff] }
 0x2db   :  { %1496 = vrot.lane.b32.xlu1 %v1432_v22, %s2324_s17  ;;  %1460 = vrot.lane.b32.xlu0 %v1432_v22, %s2323_s11  ;;  %v988_v17 = vadd.f32 %v3754_v44, %v753_v23 }
 0x2dc   :  { %1558 = vmatprep.subr.mxu0 %v1433_v57 }
 0x2dd   :  { %1559 = vmatpush1.msra.mxu0 %v1432_v22  ;;  %v3759_v22 = vld [vmem:[#allocation38_spill] sm:$0xff] }
 0x2de   :  { %1560 = vmatprep.subr.mxu0 %v1431_v12  ;;  %v791_v41 = vadd.f32 %v3046_v56, %v3759_v22 }
 0x2df   :  { %1561 = vmatpush1.msra.mxu0 %v1430_v59  ;;  %1492 = vrot.lane.b32.xlu1 %v1430_v59, %s2324_s17 }
 0x2e0   :  { %1458 = vrot.lane.b32.xlu0 %v1430_v59, %s2323_s11  ;;  %1562 = vmatprep.subr.mxu0 %v1429_v61 }
 0x2e1   :  { %1563 = vmatpush1.msra.mxu0 %v1428_v20 }
 0x2e2   :  { %2240 = vmatmul.mubr.msk.f32.vlgmr.msra.gmra.mxu0 %vm94_vm0, %v2552_v27  ;;  %v45_v27 = vld [vmem:[%s3635_s6 + $0x10] sm:$0xff] }
 0x2e3   :  { %1446 = vrot.lane.b32.xlu1 %v1435_v45, %s2323_s11  ;;  %1602 = vmatprep.mubr.f32.mxu0 %v3738_v4 }
 0x2e4   :  { %1456 = vrot.lane.b32.xlu0 %v1428_v20, %s2323_s11 }
 0x2e6   :  { %2241 = vmatmul.mubr.msk.f32.gmra.mxu0 %vm94_vm0, %v2562_v28  ;;  %v46_v28 = vld [vmem:[%s3635_s6 + $0x18] sm:$0xff]  ;;  %s2325_s6 = smov 16  }
 0x2e7   :  { %1444 = vrot.lane.b32.xlu1 %v1433_v57, %s2323_s11  ;;  %1608 = vmatprep.mubr.f32.mxu0 %v3738_v4 }
 0x2e8   :  { %1502 = vrot.lane.b32.xlu0 %v1435_v45, %s2324_s17  ;;  %v3758_v45 = vld [vmem:[#allocation37_spill] sm:$0xff] }
 0x2e9   :  { %v789_v39 = vadd.f32 %v3041_v36, %v3758_v45  ;;  %v3762_v36 = vld [vmem:[#allocation40_spill] sm:$0xff] }
 0x2ea   :  { %2242 = vmatmul.mubr.msk.f32.gmra.mxu0 %vm94_vm0, %v2572_v29  ;;  %v743_v29 = vadd.f32 %v3002_v9, %v2948_v5  ;;  %v3740_v9 = vld [vmem:[#allocation36_spill] sm:$0xff]  ;;  %v3741_v5 = vld [vmem:[#allocation50_spill] sm:$0xff] }
 0x2eb   :  { %1442 = vrot.lane.b32.xlu1 %v1431_v12, %s2323_s11  ;;  %1614 = vmatprep.mubr.f32.mxu0 %v3738_v4 }
 0x2ec   :  { %1498 = vrot.lane.b32.xlu0 %v1433_v57, %s2324_s17 }
 0x2ee   :  { %2243 = vmatmul.mubr.msk.f32.gmra.mxu0 %vm94_vm0, %v2582_v30  ;;  %v961_v30 = vpop.f32.mrf.mxu1 }
 0x2ef   :  { %1440 = vrot.lane.b32.xlu1 %v1429_v61, %s2323_s11  ;;  %1620 = vmatprep.mubr.f32.mxu0 %v3738_v4  ;;  %v1000_v57 = vadd.f32 %v961_v30, %v789_v39 }
 0x2f0   :  { %1494 = vrot.lane.b32.xlu0 %v1431_v12, %s2324_s17  ;;  %v963_v62 = vpop.f32.mrf.mxu1  ;;  %v3761_v12 = vld [vmem:[#allocation39_spill] sm:$0xff] }
 0x2f1   :  { %v1001_v49 = vadd.f32 %v963_v62, %v791_v41  ;;  %v795_v59 = vadd.f32 %v3051_v37, %v3761_v12  ;;  %v3764_v37 = vld [vmem:[#allocation44_spill] sm:$0xff] }
 0x2f2   :  { %2244 = vmatmul.mubr.msk.f32.gmra.mxu0 %vm94_vm0, %v2592_v31  ;;  %v749_v31 = vadd.f32 %v3010_v47, %v2952_v6  ;;  %v761_v6 = vadd.f32 %v3741_v5, %v3740_v9  ;;  %v967_v54 = vpop.f32.mrf.mxu1 }
 0x2f3   :  { %1488 = vrot.lane.b32.xlu1 %v1428_v20, %s2324_s17  ;;  %1626 = vmatprep.mubr.f32.mxu0 %v3738_v4  ;;  %v797_v20 = vadd.f32 %v3056_v2, %v3762_v36  ;;  %v1002_v56 = vadd.f32 %v967_v54, %v795_v59 }
 0x2f4   :  { %1490 = vrot.lane.b32.xlu0 %v1429_v61, %s2324_s17  ;;  %v987_v15 = vadd.f32 %v3030_v60, %v749_v31  ;;  %v3743_v60 = vld [vmem:[#allocation56_spill] sm:$0xff]  ;;  %v969_v38 = vpop.f32.mrf.mxu1 }
 0x2f5   :  { %v991_v18 = vadd.f32 %v3743_v60, %v761_v6 }
 0x2f6   :  { %2245 = vmatmul.mubr.msk.f32.gmra.mxu0 %vm94_vm0, %v2602_v32  ;;  %v985_v32 = vadd.f32 %v3026_v55, %v743_v29  ;;  %v3742_v55 = vld [vmem:[#allocation54_spill] sm:$0xff]  ;;  %v973_v51 = vpop.f32.mrf.mxu1  ;;  %v803_v29 = vadd.f32 %v3066_v50, %v3764_v37 }
 0x2f7   :  { %1010 = vperm.xlu1 %2293, %v43_v25   ;;  %1632 = vmatprep.mubr.f32.mxu0 %v3738_v4  ;;  %v1003_v25 = vadd.f32 %v969_v38, %v797_v20 }
 0x2f8   :  { %1015 = vperm.xlu0 %2292, %v44_v7   ;;  %v975_v61 = vpop.f32.mrf.mxu1  ;;  %v3763_v7 = vld [vmem:[#allocation42_spill] sm:$0xff] }
 0x2f9   :  { %v1005_v31 = vadd.f32 %v975_v61, %v803_v29 }
 0x2fa   :  { %2246 = vmatmul.mubr.msk.f32.gmra.mxu0 %vm94_vm0, %v2612_v33  ;;  %v3739_v33 = vld [vmem:[#allocation47_spill] sm:$0xff] }
 0x2fb   :  { %1020 = vperm.xlu1 %2293, %v45_v27   ;;  %1638 = vmatprep.mubr.f32.mxu0 %v3738_v4  ;;  %v755_v8 = vadd.f32 %v3739_v33, %v2956_v21  ;;  %v3746_v21 = vld [vmem:[#allocation41_spill] sm:$0xff]  ;;  %v801_v27 = vadd.f32 %v3061_v3, %v3763_v7  ;;  %v3766_v33 = vld [vmem:[#allocation48_spill] sm:$0xff] }
 0x2fc   :  { %1025 = vperm.xlu0 %2292, %v46_v28   ;;  %v979_v28 = vpop.f32.mrf.mxu1 }
 0x2fd   :  { %v989_v47 = vadd.f32 %v3742_v55, %v755_v8  ;;  %v1004_v30 = vadd.f32 %v973_v51, %v801_v27  ;;  %v809_v8 = vadd.f32 %v3076_v10, %v3766_v33 }
 0x2fe   :  { %2247 = vmatmul.mubr.msk.f32.gmra.mxu0 %vm94_vm0, %v2620_v34  ;;  %v3745_v34 = vld [vmem:[#allocation33_spill] sm:$0xff] }
 0x2ff   :  { %1040 = vrot.lane.b32.xlu1 %v985_v32, %s2325_s6  ;;  %1644 = vmatprep.mubr.f32.mxu0 %v3738_v4  ;;  %v741_v53 = vadd.f32 %v3746_v21, %v3745_v34  ;;  %v3765_v32 = vld [vmem:[#allocation46_spill] sm:$0xff]  ;;  %v3768_v21 = vld [vmem:[#allocation7_spill] sm:$0xff] }
 0x300   :  { %1042 = vrot.lane.b32.xlu0 %v987_v15, %s2325_s6  ;;  %v807_v2 = vadd.f32 %v3071_v24, %v3765_v32  ;;  %v981_v15 = vpop.f32.mrf.mxu1  ;;  %v3774_v32 = vld [vmem:[#allocation13_spill] sm:$0xff] }
 0x301   :  { %v984_v1 = vadd.f32 %v3749_v35, %v741_v53  ;;  %v1007_v62 = vadd.f32 %v981_v15, %v809_v8  ;;  %v3776_v8 = vld [vmem:[#allocation14_spill] sm:$0xff] }
 0x302   :  { %2248 = vmatmul.mubr.msk.f32.gmra.mxu0 %vm94_vm0, %v3744_v16  ;;  %v1006_v3 = vadd.f32 %v979_v28, %v807_v2  ;;  %v3767_v16 = vld [vmem:[#allocation8_spill] sm:$0xff]  ;;  %v3771_v28 = vld [vmem:[#allocation11_spill] sm:$0xff]  ;;  %v3775_v2 = vld [vmem:[#allocation18_spill] sm:$0xff] }
 0x303   :  { %1044 = vrot.lane.b32.xlu1 %v989_v47, %s2325_s6  ;;  %1650 = vmatprep.mubr.f32.mxu0 %v3738_v4 }
 0x304   :  { %1046 = vrot.lane.b32.xlu0 %v991_v18, %s2325_s6 }
 0x306   :  { %2249 = vmatmul.mubr.msk.f32.gmra.mxu0 %vm94_vm0, %v3751_v19  ;;  %v3769_v19 = vld [vmem:[#allocation9_spill] sm:$0xff] }
 0x307   :  { %1056 = vrot.lane.b32.xlu1 %v984_v1, %s2325_s6  ;;  %1656 = vmatprep.mubr.f32.mxu0 %v3738_v4 }
 0x308   :  { %1058 = vrot.lane.b32.xlu0 %v986_v0, %s2325_s6 }
 0x30a   :  { %2250 = vmatmul.mubr.msk.f32.gmra.mxu0 %vm94_vm0, %v3757_v46 }
 0x30b   :  { %1060 = vrot.lane.b32.xlu1 %v988_v17, %s2325_s6  ;;  %1662 = vmatprep.mubr.f32.mxu0 %v3738_v4 }
 0x30c   :  { %1062 = vrot.lane.b32.xlu0 %v990_v58, %s2325_s6 }
 0x30e   :  { %2251 = vmatmul.mubr.msk.f32.gmra.mxu0 %vm94_vm0, %v3760_v14 }
 0x30f   :  { %1123 = vrot.lane.b32.xlu1 %v1000_v57, %s2326_s20  ;;  %1870 = vmatprep.mubr.f32.mxu0 %v3738_v4 }
 0x310   :  { %1125 = vrot.lane.b32.xlu0 %v1001_v49, %s2326_s20 }
 0x313   :  { %1127 = vrot.lane.b32.xlu1 %v1002_v56, %s2326_s20 }
 0x314   :  { %1129 = vrot.lane.b32.xlu0 %v1003_v25, %s2326_s20 }
 0x317   :  { %1131 = vrot.lane.b32.xlu1 %v1004_v30, %s2326_s20  ;;  %v3772_v30 = vld [vmem:[#allocation12_spill] sm:$0xff] }
 0x318   :  { %1133 = vrot.lane.b32.xlu0 %v1005_v31, %s2326_s20  ;;  %v3773_v31 = vld [vmem:[#allocation16_spill] sm:$0xff] }
 0x31b   :  { %1135 = vrot.lane.b32.xlu1 %v1006_v3, %s2326_s20  ;;  %v3777_v3 = vld [vmem:[#allocation20_spill] sm:$0xff] }
 0x31c   :  { %1137 = vrot.lane.b32.xlu0 %v1007_v62, %s2326_s20 }
 0x349   :  { %v1463_v50 = vpop.permute.xlu0 %1462  ;;  %v1501_v9 = vpop.permute.xlu1 %1500 }
 0x34d   :  { %v1461_v5 = vpop.permute.xlu0 %1460  ;;  %v1497_v6 = vpop.permute.xlu1 %1496 }
 0x351   :  { %v1493_v55 = vpop.permute.xlu1 %1492 }
 0x352   :  { %v1459_v24 = vpop.permute.xlu0 %1458 }
 0x355   :  { %v1447_v47 = vpop.permute.xlu1 %1446 }
 0x356   :  { %v1457_v60 = vpop.permute.xlu0 %1456  ;;  %v1467_v18 = vsel %vm358_vm2, %v1463_v50, %v1447_v47  ;;  %v1479_v10 = vsel %vm358_vm2, %v1447_v47, %v1463_v50  ;;  %v3781_v47 = vld [vmem:[#allocation24_spill] sm:$0xff] }
 0x357   :  { %v1486_v34 = vmul.f32 %v1479_v10, %v3767_v16  ;;  %v1487_v53 = vmul.f32 %v1467_v18, %v3768_v21 }
 0x359   :  { %v1445_v54 = vpop.permute.xlu1 %1444  ;;  %1693 = vmatprep.subr.mxu1 %v1487_v53  ;;  %v3784_v53 = vld [vmem:[#allocation26_spill] sm:$0xff] }
 0x35a   :  { %v1503_v52 = vpop.permute.xlu0 %1502  ;;  %v1466_v63 = vsel %vm358_vm2, %v1461_v5, %v1445_v54  ;;  %v1478_v26 = vsel %vm358_vm2, %v1445_v54, %v1461_v5  ;;  %1694 = vmatpush1.msra.mxu1 %v1486_v34  ;;  %v3779_v5 = vld [vmem:[#allocation22_spill] sm:$0xff] }
 0x35b   :  { %v1507_v35 = vsel %vm418_vm3, %v1501_v9, %v1503_v52  ;;  %v1523_v1 = vsel %vm418_vm3, %v1503_v52, %v1501_v9  ;;  %v1484_v40 = vmul.f32 %v1478_v26, %v3767_v16  ;;  %v1485_v0 = vmul.f32 %v1466_v63, %v3768_v21  ;;  %v3778_v9 = vld [vmem:[#allocation15_spill] sm:$0xff]  ;;  %v2318_v52 = vld [vmem:[%s3634_s7] sm:$0xff] }
 0x35c   :  { %v1530_v11 = vmul.f32 %v1507_v35, %v3769_v19  ;;  %v1531_v23 = vmul.f32 %v1523_v1, %v3770_v42 }
 0x35d   :  { %v1443_v38 = vpop.permute.xlu1 %1442  ;;  %1695 = vmatprep.subr.mxu1 %v1485_v0  ;;  %v3785_v0 = vld [vmem:[#allocation21_spill] sm:$0xff] }
 0x35e   :  { %v1499_v44 = vpop.permute.xlu0 %1498  ;;  %1830 = vmatprep.subr.mxu0 %v1531_v23  ;;  %v1465_v17 = vsel %vm358_vm2, %v1459_v24, %v1443_v38  ;;  %v1477_v43 = vsel %vm358_vm2, %v1443_v38, %v1459_v24  ;;  %1696 = vmatpush1.msra.mxu1 %v1484_v40  ;;  %v3780_v24 = vld [vmem:[#allocation17_spill] sm:$0xff] }
 0x35f   :  { %v1506_v48 = vsel %vm418_vm3, %v1497_v6, %v1499_v44  ;;  %v1522_v58 = vsel %vm418_vm3, %v1499_v44, %v1497_v6  ;;  %v1482_v46 = vmul.f32 %v1477_v43, %v3767_v16  ;;  %v1483_v45 = vmul.f32 %v1465_v17, %v3768_v21  ;;  %1831 = vmatpush1.msra.mxu0 %v1530_v11 }
 0x360   :  { %v1528_v39 = vmul.f32 %v1506_v48, %v3769_v19  ;;  %v1529_v51 = vmul.f32 %v1522_v58, %v3770_v42 }
 0x361   :  { %v1441_v22 = vpop.permute.xlu1 %1440  ;;  %1697 = vmatprep.subr.mxu1 %v1483_v45  ;;  %v3787_v45 = vld [vmem:[#allocation23_spill] sm:$0xff] }
 0x362   :  { %v1495_v41 = vpop.permute.xlu0 %1494  ;;  %1832 = vmatprep.subr.mxu0 %v1529_v51  ;;  %v1464_v57 = vsel %vm358_vm2, %v1457_v60, %v1441_v22  ;;  %v1476_v49 = vsel %vm358_vm2, %v1441_v22, %v1457_v60  ;;  %1698 = vmatpush1.msra.mxu1 %v1482_v46  ;;  %v3782_v60 = vld [vmem:[#allocation6_spill] sm:$0xff] }
 0x363   :  { %v1505_v14 = vsel %vm418_vm3, %v1493_v55, %v1495_v41  ;;  %v1521_v12 = vsel %vm418_vm3, %v1495_v41, %v1493_v55  ;;  %v1480_v59 = vmul.f32 %v1476_v49, %v3767_v16  ;;  %v1481_v61 = vmul.f32 %v1464_v57, %v3768_v21  ;;  %1833 = vmatpush1.msra.mxu0 %v1528_v39  ;;  %v3783_v21 = vld [vmem:[#allocation19_spill] sm:$0xff]  ;;  %v3788_v39 = vld [vmem:[#allocation29_spill] sm:$0xff] }
 0x364   :  { %v1526_v36 = vmul.f32 %v1505_v14, %v3769_v19  ;;  %v1527_v20 = vmul.f32 %v1521_v12, %v3770_v42  ;;  %v1083_v18 = vsub.s32 2, %v3782_v60  ;;  %v1087_v10 = vsub.s32 6, %v3782_v60 }
 0x365   :  { %v1489_v56 = vpop.permute.xlu1 %1488  ;;  %1699 = vmatprep.subr.mxu1 %v1481_v61  ;;  %v1162_v54 = vsub.s32 3, %v3782_v60  ;;  %v1166_v35 = vsub.s32 7, %v3782_v60  ;;  %v3789_v61 = vld [vmem:[#allocation58_spill] sm:$0xff] }
 0x366   :  { %v1491_v25 = vpop.permute.xlu0 %1490  ;;  %1834 = vmatprep.subr.mxu0 %v1527_v20  ;;  %1700 = vmatpush1.msra.mxu1 %v1480_v59  ;;  %v1084_v63 = vrot.slane %v2318_v52, %v1083_v18  ;;  %v1088_v26 = vrot.slane %v2318_v52, %v1087_v10  ;;  %v3790_v20 = vld [vmem:[#allocation59_spill] sm:$0xff] }
 0x367   :  { %v1504_v7 = vsel %vm418_vm3, %v1489_v56, %v1491_v25  ;;  %v1520_v27 = vsel %vm418_vm3, %v1491_v25, %v1489_v56  ;;  %1835 = vmatpush1.msra.mxu0 %v1526_v36  ;;  %2252 = vmatmul.mubr.msk.f32.vlgmr.msra.gmra.mxu1 %vm94_vm0, %v3771_v28  ;;  %v1163_v11 = vrot.slane %v2318_v52, %v1162_v54  ;;  %v3791_v25 = vld [vmem:[#allocation57_spill] sm:$0xff] }
 0x368   :  { %v1524_v37 = vmul.f32 %v1504_v7, %v3769_v19  ;;  %v1525_v29 = vmul.f32 %v1520_v27, %v3770_v42  ;;  %1739 = vmatprep.mubr.f32.mxu1 %v3738_v4  ;;  %v3786_v19 = vld [vmem:[#allocation28_spill] sm:$0xff]  ;;  %v3327_v42 = vrot.slane %v1084_v63, %v1083_v18  ;;  %v3329_v23 = vrot.slane %v1088_v26, %v1083_v18  ;;  %v3796_v26 = vld [vmem:[#allocation31_spill] sm:$0xff] }
 0x369   :  { %v1167_v38 = vrot.slane %v2318_v52, %v1166_v35  ;;  %v3341_v51 = vrot.slane %v1163_v11, %v1162_v54  ;;  %v3798_v11 = vld [vmem:[#allocation61_spill] sm:$0xff] }
 0x36a   :  { %1836 = vmatprep.subr.mxu0 %v1525_v29 }
 0x36b   :  { %1837 = vmatpush1.msra.mxu0 %v1524_v37  ;;  %2253 = vmatmul.mubr.msk.f32.gmra.mxu1 %vm94_vm0, %v3772_v30  ;;  %v3347_v57 = vrot.slane %v1167_v38, %v1162_v54  ;;  %v3792_v37 = vld [vmem:[#allocation25_spill] sm:$0xff] }
 0x36c   :  { %2264 = vmatmul.mubr.msk.f32.vlgmr.msra.gmra.mxu0 %vm94_vm0, %v3773_v31  ;;  %1745 = vmatprep.mubr.f32.mxu1 %v3738_v4  ;;  %v3793_v31 = vld [vmem:[#allocation30_spill] sm:$0xff] }
 0x36d   :  { %1876 = vmatprep.mubr.f32.mxu0 %v3738_v4 }
 0x36f   :  { %2254 = vmatmul.mubr.msk.f32.gmra.mxu1 %vm94_vm0, %v3774_v32 }
 0x370   :  { %2265 = vmatmul.mubr.msk.f32.gmra.mxu0 %vm94_vm0, %v3775_v2  ;;  %1751 = vmatprep.mubr.f32.mxu1 %v3738_v4 }
 0x371   :  { %1882 = vmatprep.mubr.f32.mxu0 %v3738_v4 }
 0x372   :  { %v3282_v15 = vpop.permute.xlu1 %1010 }
 0x373   :  { %v3284_v33 = vpop.permute.xlu0 %1015  ;;  %2255 = vmatmul.mubr.msk.f32.gmra.mxu1 %vm94_vm0, %v3776_v8  ;;  %v1028_v49 = vadd.f32 %v3282_v15, %v3044_v13  ;;  %v1029_v7 = vadd.f32 %v3282_v15, %v3791_v25  ;;  %v3800_v25 = vld [vmem:[#allocation63_spill] sm:$0xff] }
 0x374   :  { %2266 = vmatmul.mubr.msk.f32.gmra.mxu0 %vm94_vm0, %v3777_v3  ;;  %1757 = vmatprep.mubr.f32.mxu1 %v3738_v4  ;;  %v1030_v36 = vadd.f32 %v3284_v33, %v3789_v61  ;;  %v1031_v56 = vadd.f32 %v3284_v33, %v3790_v20 }
 0x375   :  { %1888 = vmatprep.mubr.f32.mxu0 %v3738_v4 }
 0x376   :  { %v3292_v62 = vpop.permute.xlu1 %1020 }
 0x377   :  { %v3294_v50 = vpop.permute.xlu0 %1025  ;;  %2256 = vmatmul.mubr.msk.f32.gmra.mxu1 %vm94_vm0, %v3778_v9  ;;  %v3794_v9 = vld [vmem:[#allocation60_spill] sm:$0xff]  ;;  %v1033_v38 = vadd.f32 %v3292_v62, %v3798_v11 }
 0x378   :  { %2267 = vmatmul.mubr.msk.f32.gmra.mxu0 %vm94_vm0, %v3779_v5  ;;  %1763 = vmatprep.mubr.f32.mxu1 %v3738_v4  ;;  %v1032_v5 = vadd.f32 %v3292_v62, %v3794_v9 }
 0x379   :  { %1894 = vmatprep.mubr.f32.mxu0 %v3738_v4 }
 0x37a   :  { %v1041_v6 = vpop.permute.xlu1 %1040 }
 0x37b   :  { %v1043_v55 = vpop.permute.xlu0 %1042  ;;  %2257 = vmatmul.mubr.msk.f32.gmra.mxu1 %vm94_vm0, %v3780_v24 }
 0x37c   :  { %2268 = vmatmul.mubr.msk.f32.gmra.mxu0 %vm94_vm0, %v3781_v47  ;;  %1769 = vmatprep.mubr.f32.mxu1 %v3738_v4 }
 0x37d   :  { %1900 = vmatprep.mubr.f32.mxu0 %v3738_v4 }
 0x37e   :  { %v1045_v16 = vpop.permute.xlu1 %1044 }
 0x37f   :  { %v3310_v34 = vpop.permute.xlu0 %1046  ;;  %2258 = vmatmul.mubr.msk.f32.gmra.mxu1 %vm94_vm0, %v3783_v21 }
 0x380   :  { %2269 = vmatmul.mubr.msk.f32.gmra.mxu0 %vm94_vm0, %v3784_v53  ;;  %1775 = vmatprep.mubr.f32.mxu1 %v3738_v4  ;;  %v3795_v53 = vld [vmem:[#allocation27_spill] sm:$0xff] }
 0x381   :  { %1906 = vmatprep.mubr.f32.mxu0 %v3738_v4 }
 0x382   :  { %v1057_v1 = vpop.permute.xlu1 %1056 }
 0x383   :  { %v1059_v40 = vpop.permute.xlu0 %1058  ;;  %2259 = vmatmul.mubr.msk.f32.gmra.mxu1 %vm94_vm0, %v3785_v0  ;;  %v1065_v44 = vsel %vm1064_vm4, %v1057_v1, %v1041_v6  ;;  %v1077_v17 = vsel %vm1064_vm4, %v1041_v6, %v1057_v1  ;;  %v3797_v0 = vld [vmem:[#allocation62_spill] sm:$0xff] }
 0x384   :  { %2270 = vmatmul.mubr.msk.f32.gmra.mxu0 %vm94_vm0, %v3786_v19  ;;  %1781 = vmatprep.mubr.f32.mxu1 %v3738_v4  ;;  %v1066_v48 = vsel %vm1064_vm4, %v1059_v40, %v1043_v55  ;;  %v1078_v58 = vsel %vm1064_vm4, %v1043_v55, %v1059_v40  ;;  %v1099_v22 = vmul.f32 %v3327_v42, %v1077_v17 }
 0x385   :  { %1912 = vmatprep.mubr.f32.mxu0 %v3738_v4  ;;  %v1100_v41 = vmul.f32 %v3329_v23, %v1065_v44  ;;  %v1101_v14 = vmul.f32 %v3327_v42, %v1078_v58  ;;  %v1102_v12 = vmul.f32 %v3329_v23, %v1066_v48  ;;  %v1034_v19 = vadd.f32 %v3294_v50, %v3797_v0 }
 0x386   :  { %v1061_v43 = vpop.permute.xlu1 %1060  ;;  %v1107_v32 = vadd.f32 %v1099_v22, %v1028_v49  ;;  %v2319_v22 = vld [vmem:[%s3633_s5 + $0x58] sm:$0xff] }
 0x387   :  { %v1063_v46 = vpop.permute.xlu0 %1062  ;;  %2260 = vmatmul.mubr.msk.f32.gmra.mxu1 %vm94_vm0, %v3787_v45  ;;  %v1079_v27 = vsel %vm1064_vm4, %v1045_v16, %v1061_v43  ;;  %v1067_v13 = vsel %vm1064_vm4, %v1061_v43, %v1045_v16  ;;  %v1108_v2 = vadd.f32 %v1100_v41, %v1029_v7  ;;  %v1109_v6 = vadd.f32 %v1101_v14, %v1030_v36 }
 0x388   :  { %2271 = vmatmul.mubr.msk.f32.gmra.mxu0 %vm94_vm0, %v3788_v39  ;;  %1787 = vmatprep.mubr.f32.mxu1 %v3738_v4  ;;  %v1110_v55 = vadd.f32 %v1102_v12, %v1031_v56  ;;  %v1103_v24 = vmul.f32 %v3327_v42, %v1079_v27  ;;  %v1104_v60 = vmul.f32 %v3329_v23, %v1067_v13  ;;  %v3799_v12 = vld [vmem:[#allocation32_spill] sm:$0xff] }
 0x389   :  { %1918 = vmatprep.mubr.f32.mxu0 %v3738_v4  ;;  %v1080_v18 = vsel %vm1064_vm4, %v3310_v34, %v1063_v46  ;;  %v1068_v54 = vsel %vm1064_vm4, %v1063_v46, %v3310_v34  ;;  %v1035_v7 = vadd.f32 %v3294_v50, %v3800_v25 }
 0x38a   :  { %v1124_v59 = vpop.permute.xlu1 %1123  ;;  %v1105_v44 = vmul.f32 %v3327_v42, %v1080_v18  ;;  %v1111_v48 = vadd.f32 %v1103_v24, %v1032_v5  ;;  %v1106_v58 = vmul.f32 %v3329_v23, %v1068_v54  ;;  %v1112_v41 = vadd.f32 %v1104_v60, %v1033_v38 }
 0x38b   :  { %v1126_v28 = vpop.permute.xlu0 %1125  ;;  %2261 = vmatmul.mubr.msk.f32.gmra.mxu1 %vm94_vm0, %v3792_v37 }
 0x38c   :  { %v1140_v29 = vsel %vm1139_vm5, %v1124_v59, %v1126_v28  ;;  %v1156_v30 = vsel %vm1139_vm5, %v1126_v28, %v1124_v59  ;;  %2272 = vmatmul.mubr.msk.f32.gmra.mxu0 %vm94_vm0, %v3793_v31  ;;  %1793 = vmatprep.mubr.f32.mxu1 %v3738_v4  ;;  %v1113_v37 = vadd.f32 %v1105_v44, %v1034_v19 }
 0x38d   :  { %v1178_v8 = vmul.f32 %v3341_v51, %v1140_v29  ;;  %v1179_v3 = vmul.f32 %v3347_v57, %v1156_v30  ;;  %1924 = vmatprep.mubr.f32.mxu0 %v3738_v4  ;;  %v1114_v31 = vadd.f32 %v1106_v58, %v1035_v7 }
 0x38e   :  { %v1128_v47 = vpop.permute.xlu1 %1127 }
 0x38f   :  { %v1186_v10 = vadd.f32 %v1178_v8, %v1107_v32  ;;  %v1187_v16 = vadd.f32 %v1179_v3, %v1108_v2  ;;  %v1130_v21 = vpop.permute.xlu0 %1129  ;;  %2262 = vmatmul.mubr.msk.f32.gmra.mxu1 %vm94_vm0, %v3795_v53 }
 0x390   :  { %v1141_v52 = vsel %vm1139_vm5, %v1128_v47, %v1130_v21  ;;  %v1157_v63 = vsel %vm1139_vm5, %v1130_v21, %v1128_v47  ;;  %2273 = vmatmul.mubr.msk.f32.gmra.mxu0 %vm94_vm0, %v3796_v26  ;;  %1799 = vmatprep.mubr.f32.mxu1 %v3738_v4 }
 0x391   :  { %1194 = vst [vmem:[%s3636_s8] sm:$0xff] %v1186_v10  ;;  %1195 = vst [vmem:[%s3636_s8 + $0x8] sm:$0xff] %v1187_v16  ;;  %v1180_v35 = vmul.f32 %v3341_v51, %v1141_v52  ;;  %v1181_v34 = vmul.f32 %v3347_v57, %v1157_v63  ;;  %1930 = vmatprep.mubr.f32.mxu0 %v3738_v4  ;;  %v3395_v1 = vadd.f32 %v1187_v16, %v1186_v10 }
 0x392   :  { %v1220_v40 = vmul.f32 %v1186_v10, %v1186_v10  ;;  %v1132_v17 = vpop.permute.xlu1 %1131  ;;  %v1221_v43 = vmul.f32 %v1187_v16, %v1187_v16 }
 0x393   :  { %v1188_v46 = vadd.f32 %v1180_v35, %v1109_v6  ;;  %v1189_v45 = vadd.f32 %v1181_v34, %v1110_v55  ;;  %v1134_v39 = vpop.permute.xlu0 %1133  ;;  %2263 = vmatmul.mubr.msk.f32.gmra.mxu1 %vm94_vm0, %v2319_v22 }
 0x394   :  { %v1142_v49 = vsel %vm1139_vm5, %v1132_v17, %v1134_v39  ;;  %v1158_v14 = vsel %vm1139_vm5, %v1134_v39, %v1132_v17  ;;  %2274 = vmatmul.mubr.msk.f32.gmra.mxu0 %vm94_vm0, %v3799_v12  ;;  %v3411_v59 = vadd.f32 %v1221_v43, %v1220_v40 }
 0x395   :  { %1196 = vst [vmem:[%s3636_s8 + $0x10] sm:$0xff] %v1188_v46  ;;  %1197 = vst [vmem:[%s3636_s8 + $0x18] sm:$0xff] %v1189_v45  ;;  %v1182_v61 = vmul.f32 %v3341_v51, %v1142_v49  ;;  %v1183_v36 = vmul.f32 %v3347_v57, %v1158_v14  ;;  %1936 = vmatprep.mubr.f32.mxu0 %v3738_v4  ;;  %v3422_v20 = vadd.f32 %v1189_v45, %v1188_v46  ;;  %v2320_v4 = vld [vmem:[%s3633_s5 + $0x118] sm:$0xff] }
 0x396   :  { %v1222_v56 = vmul.f32 %v1188_v46, %v1188_v46  ;;  %v1136_v27 = vpop.permute.xlu1 %1135  ;;  %v1223_v28 = vmul.f32 %v1189_v45, %v1189_v45 }
 0x397   :  { %v1190_v13 = vadd.f32 %v1182_v61, %v1111_v48  ;;  %v1191_v29 = vadd.f32 %v1183_v36, %v1112_v41  ;;  %v1138_v30 = vpop.permute.xlu0 %1137 }
 0x398   :  { %v1143_v32 = vsel %vm1139_vm5, %v1136_v27, %v1138_v30  ;;  %v1159_v2 = vsel %vm1139_vm5, %v1138_v30, %v1136_v27  ;;  %2275 = vmatmul.mubr.msk.f32.gmra.mxu0 %vm94_vm0, %v2320_v4  ;;  %v3432_v8 = vadd.f32 %v1223_v28, %v1222_v56 }
 0x399   :  { %1198 = vst [vmem:[%s3636_s8 + $0x20] sm:$0xff] %v1190_v13  ;;  %1199 = vst [vmem:[%s3636_s8 + $0x28] sm:$0xff] %v1191_v29  ;;  %v1184_v3 = vmul.f32 %v3341_v51, %v1143_v32  ;;  %v1185_v9 = vmul.f32 %v3347_v57, %v1159_v2  ;;  %v3442_v5 = vadd.f32 %v1191_v29, %v1190_v13 }
 0x39a   :  { %v1224_v6 = vmul.f32 %v1190_v13, %v1190_v13  ;;  %v1225_v55 = vmul.f32 %v1191_v29, %v1191_v29 }
 0x39b   :  { %v1192_v24 = vadd.f32 %v1184_v3, %v1113_v37  ;;  %v1193_v47 = vadd.f32 %v1185_v9, %v1114_v31 }
 0x39c   :  { %v3444_v60 = vadd.f32 %v1225_v55, %v1224_v6 }
 0x39d   :  { %1200 = vst [vmem:[%s3636_s8 + $0x30] sm:$0xff] %v1192_v24  ;;  %1201 = vst [vmem:[%s3636_s8 + $0x38] sm:$0xff] %v1193_v47  ;;  %v3452_v18 = vadd.f32 %v1193_v47, %v1192_v24  ;;  %v1226_v10 = vmul.f32 %v1192_v24, %v1192_v24  ;;  %v1227_v16 = vmul.f32 %v1193_v47, %v1193_v47 }
 0x39f   :  { %v3454_v21 = vadd.f32 %v1227_v16, %v1226_v10 }
 0x3a2   :  { %v1598_v53 = vpop.f32.mrf.mxu0 }
 0x3a4   :  { %v1600_v54 = vpop.f32.mrf.mxu0 }
 0x3a6   :  { %v1604_v52 = vpop.f32.mrf.mxu0 }
 0x3a8   :  { %v1606_v63 = vpop.f32.mrf.mxu0 }
 0x3aa   :  { %v1610_v26 = vpop.f32.mrf.mxu0 }
 0x3ac   :  { %v1612_v35 = vpop.f32.mrf.mxu0 }
 0x3ae   :  { %v1616_v34 = vpop.f32.mrf.mxu0 }
 0x3b0   :  { %v1618_v40 = vpop.f32.mrf.mxu0 }
 0x3b2   :  { %v1622_v0 = vpop.f32.mrf.mxu0 }
 0x3b4   :  { %v1624_v19 = vpop.f32.mrf.mxu0 }
 0x3b6   :  { %v1628_v11 = vpop.f32.mrf.mxu0 }
 0x3b8   :  { %v3456_v38 = vpop.f32.mrf.mxu0 }
 0x3ba   :  { %v3458_v44 = vpop.f32.mrf.mxu0 }
 0x3bc   :  { %v3460_v17 = vpop.f32.mrf.mxu0 }
 0x3be   :  { %v3462_v43 = vpop.f32.mrf.mxu0 }
 0x3c0   :  { %v3464_v48 = vpop.f32.mrf.mxu0 }
 0x3c2   :  { %v3466_v58 = vpop.f32.mrf.mxu0 }
 0x3c4   :  { %v3468_v46 = vpop.f32.mrf.mxu0 }
 0x3c6   :  { %v3470_v45 = vpop.f32.mrf.mxu0 }
 0x3c8   :  { %v3472_v39 = vpop.f32.mrf.mxu0 }
 0x3ca   :  { %v3474_v22 = vpop.f32.mrf.mxu0 }
 0x3cc   :  { %v3476_v41 = vpop.f32.mrf.mxu0 }
 0x3ce   :  { %v3478_v49 = vpop.f32.mrf.mxu0 }
 0x3d0   :  { %v3480_v61 = vpop.f32.mrf.mxu0 }
 0x427   :  { %v1735_v14 = vpop.f32.mrf.mxu1 }
 0x428   :  { %v1736_v36 = vadd.f32 %v1735_v14, %v1598_v53 }
 0x429   :  { %v1737_v12 = vpop.f32.mrf.mxu1 }
 0x42a   :  { %v1738_v37 = vadd.f32 %v1737_v12, %v1600_v54 }
 0x42b   :  { %v1741_v56 = vpop.f32.mrf.mxu1 }
 0x42c   :  { %v1872_v25 = vpop.f32.mrf.mxu0  ;;  %v1742_v13 = vadd.f32 %v1741_v56, %v1604_v52 }
 0x42d   :  { %v1943_v7 = vadd.f32 %v1872_v25, %v1736_v36  ;;  %v1743_v27 = vpop.f32.mrf.mxu1 }
 0x42e   :  { %v1874_v28 = vpop.f32.mrf.mxu0  ;;  %v1744_v3 = vadd.f32 %v1743_v27, %v1606_v63 }
 0x42f   :  { %1995 = vrot.lane.b32.xlu1 %v1943_v7, %s2325_s6  ;;  %v1747_v29 = vpop.f32.mrf.mxu1  ;;  %v1944_v31 = vadd.f32 %v1874_v28, %v1738_v37 }
 0x430   :  { %v1878_v30 = vpop.f32.mrf.mxu0  ;;  %v1748_v9 = vadd.f32 %v1747_v29, %v1610_v26 }
 0x431   :  { %v1945_v32 = vadd.f32 %v1878_v30, %v1742_v13  ;;  %v1749_v2 = vpop.f32.mrf.mxu1 }
 0x432   :  { %v1880_v4 = vpop.f32.mrf.mxu0  ;;  %v1750_v53 = vadd.f32 %v1749_v2, %v1612_v35 }
 0x433   :  { %1979 = vrot.lane.b32.xlu1 %v1944_v31, %s2325_s6  ;;  %1997 = vrot.lane.b32.xlu0 %v1945_v32, %s2325_s6  ;;  %v1753_v6 = vpop.f32.mrf.mxu1  ;;  %v1946_v24 = vadd.f32 %v1880_v4, %v1744_v3 }
 0x434   :  { %v1884_v55 = vpop.f32.mrf.mxu0  ;;  %v1754_v54 = vadd.f32 %v1753_v6, %v1616_v34 }
 0x435   :  { %v1947_v47 = vadd.f32 %v1884_v55, %v1748_v9  ;;  %v1755_v10 = vpop.f32.mrf.mxu1 }
 0x436   :  { %v1886_v16 = vpop.f32.mrf.mxu0  ;;  %v1756_v56 = vadd.f32 %v1755_v10, %v1618_v40 }
 0x437   :  { %1999 = vrot.lane.b32.xlu1 %v1947_v47, %s2325_s6  ;;  %1981 = vrot.lane.b32.xlu0 %v1946_v24, %s2325_s6  ;;  %v1759_v52 = vpop.f32.mrf.mxu1  ;;  %v1948_v63 = vadd.f32 %v1886_v16, %v1750_v53 }
 0x438   :  { %v1890_v14 = vpop.f32.mrf.mxu0  ;;  %v1760_v25 = vadd.f32 %v1759_v52, %v1622_v0 }
 0x439   :  { %v1949_v26 = vadd.f32 %v1890_v14, %v1754_v54  ;;  %v1761_v12 = vpop.f32.mrf.mxu1 }
 0x43a   :  { %v1892_v36 = vpop.f32.mrf.mxu0  ;;  %v1762_v35 = vadd.f32 %v1761_v12, %v1624_v19 }
 0x43b   :  { %1983 = vrot.lane.b32.xlu1 %v1948_v63, %s2325_s6  ;;  %2001 = vrot.lane.b32.xlu0 %v1949_v26, %s2325_s6  ;;  %v1765_v7 = vpop.f32.mrf.mxu1  ;;  %v1950_v34 = vadd.f32 %v1892_v36, %v1756_v56 }
 0x43c   :  { %v1896_v27 = vpop.f32.mrf.mxu0  ;;  %v1766_v29 = vadd.f32 %v1765_v7, %v1628_v11 }
 0x43d   :  { %v3489_v28 = vadd.f32 %v1896_v27, %v1760_v25  ;;  %v1767_v37 = vpop.f32.mrf.mxu1 }
 0x43e   :  { %v1898_v13 = vpop.f32.mrf.mxu0  ;;  %v1768_v0 = vadd.f32 %v1767_v37, %v3456_v38 }
 0x43f   :  { %v3491_v30 = vadd.f32 %v1898_v13, %v1762_v35  ;;  %1985 = vrot.lane.b32.xlu0 %v1950_v34, %s2325_s6  ;;  %v1771_v31 = vpop.f32.mrf.mxu1 }
 0x440   :  { %v1902_v40 = vpop.f32.mrf.mxu0  ;;  %v1772_v19 = vadd.f32 %v1771_v31, %v3458_v44 }
 0x441   :  { %v3495_v32 = vadd.f32 %v1902_v40, %v1766_v29  ;;  %v1773_v2 = vpop.f32.mrf.mxu1 }
 0x442   :  { %v1904_v4 = vpop.f32.mrf.mxu0  ;;  %v1774_v11 = vadd.f32 %v1773_v2, %v3460_v17 }
 0x443   :  { %v3498_v3 = vadd.f32 %v1904_v4, %v1768_v0  ;;  %v1777_v9 = vpop.f32.mrf.mxu1 }
 0x444   :  { %v1908_v6 = vpop.f32.mrf.mxu0  ;;  %v1778_v10 = vadd.f32 %v1777_v9, %v3462_v43 }
 0x445   :  { %v3501_v55 = vadd.f32 %v1908_v6, %v1772_v19  ;;  %v1779_v24 = vpop.f32.mrf.mxu1 }
 0x446   :  { %v1910_v47 = vpop.f32.mrf.mxu0  ;;  %v1780_v54 = vadd.f32 %v1779_v24, %v3464_v48 }
 0x447   :  { %v3504_v16 = vadd.f32 %v1910_v47, %v1774_v11  ;;  %v1783_v38 = vpop.f32.mrf.mxu1 }
 0x448   :  { %v1914_v53 = vpop.f32.mrf.mxu0  ;;  %v1784_v63 = vadd.f32 %v1783_v38, %v3466_v58 }
 0x449   :  { %v3507_v52 = vadd.f32 %v1914_v53, %v1778_v10  ;;  %v1785_v44 = vpop.f32.mrf.mxu1 }
 0x44a   :  { %v1916_v14 = vpop.f32.mrf.mxu0  ;;  %v1786_v36 = vadd.f32 %v1785_v44, %v3468_v46 }
 0x44b   :  { %v3510_v26 = vadd.f32 %v1916_v14, %v1780_v54  ;;  %v1789_v17 = vpop.f32.mrf.mxu1  ;;  %v1967_v54 = vadd.f32 %v3489_v28, %v3282_v15  ;;  %v1968_v14 = vadd.f32 %v3491_v30, %v3282_v15 }
 0x44c   :  { %v1920_v12 = vpop.f32.mrf.mxu0  ;;  %v1790_v7 = vadd.f32 %v1789_v17, %v3470_v45 }
 0x44d   :  { %v1959_v56 = vadd.f32 %v1920_v12, %v1784_v63  ;;  %v1791_v43 = vpop.f32.mrf.mxu1  ;;  %v1969_v63 = vadd.f32 %v3495_v32, %v3284_v33 }
 0x44e   :  { %v1922_v25 = vpop.f32.mrf.mxu0  ;;  %v1792_v34 = vadd.f32 %v1791_v43, %v3472_v39 }
 0x44f   :  { %v1960_v27 = vadd.f32 %v1922_v25, %v1786_v36  ;;  %2043 = vrot.lane.b32.xlu1 %v1959_v56, %s2326_s20  ;;  %v1795_v48 = vpop.f32.mrf.mxu1  ;;  %v1970_v56 = vadd.f32 %v3498_v3, %v3284_v33 }
 0x450   :  { %v1926_v35 = vpop.f32.mrf.mxu0  ;;  %v1796_v29 = vadd.f32 %v1795_v48, %v3474_v22  ;;  %v1971_v48 = vadd.f32 %v3501_v55, %v3292_v62 }
 0x451   :  { %v1961_v37 = vadd.f32 %v1926_v35, %v1790_v7  ;;  %2045 = vrot.lane.b32.xlu0 %v1960_v27, %s2326_s20  ;;  %v1797_v58 = vpop.f32.mrf.mxu1  ;;  %v1972_v35 = vadd.f32 %v3504_v16, %v3292_v62 }
 0x452   :  { %v1928_v13 = vpop.f32.mrf.mxu0  ;;  %v1798_v45 = vadd.f32 %v1797_v58, %v3476_v41 }
 0x453   :  { %v1962_v46 = vadd.f32 %v1928_v13, %v1792_v34  ;;  %2047 = vrot.lane.b32.xlu1 %v1961_v37, %s2326_s20  ;;  %v1801_v31 = vpop.f32.mrf.mxu1 }
 0x454   :  { %v1932_v40 = vpop.f32.mrf.mxu0  ;;  %v1802_v39 = vadd.f32 %v1801_v31, %v3478_v49 }
 0x455   :  { %v1963_v0 = vadd.f32 %v1932_v40, %v1796_v29  ;;  %2049 = vrot.lane.b32.xlu0 %v1962_v46, %s2326_s20  ;;  %v1803_v2 = vpop.f32.mrf.mxu1 }
 0x456   :  { %v1934_v4 = vpop.f32.mrf.mxu0  ;;  %v1804_v22 = vadd.f32 %v1803_v2, %v3480_v61 }
 0x457   :  { %v1964_v19 = vadd.f32 %v1934_v4, %v1798_v45  ;;  %2051 = vrot.lane.b32.xlu1 %v1963_v0, %s2326_s20  ;;  %v1973_v4 = vadd.f32 %v3507_v52, %v3294_v50 }
 0x458   :  { %v1938_v9 = vpop.f32.mrf.mxu0 }
 0x459   :  { %v1965_v6 = vadd.f32 %v1938_v9, %v1802_v39  ;;  %2053 = vrot.lane.b32.xlu0 %v1964_v19, %s2326_s20 }
 0x45a   :  { %v1940_v11 = vpop.f32.mrf.mxu0 }
 0x45b   :  { %v1966_v24 = vadd.f32 %v1940_v11, %v1804_v22  ;;  %2055 = vrot.lane.b32.xlu1 %v1965_v6, %s2326_s20 }
 0x45d   :  { %2057 = vrot.lane.b32.xlu0 %v1966_v24, %s2326_s20 }
 0x47c   :  { %1208 = vadd.xlane.f32.xlu0 %v3422_v20 }
 0x47f   :  { %1205 = vadd.xlane.f32.xlu1 %v3395_v1 }
 0x480   :  { %1211 = vadd.xlane.f32.xlu0 %v3442_v5 }
 0x483   :  { %1214 = vadd.xlane.f32.xlu1 %v3452_v18 }
 0x484   :  { %1229 = vadd.xlane.f32.xlu0 %v3411_v59 }
 0x487   :  { %1232 = vadd.xlane.f32.xlu1 %v3432_v8 }
 0x488   :  { %1235 = vadd.xlane.f32.xlu0 %v3444_v60 }
 0x48b   :  { %1238 = vadd.xlane.f32.xlu1 %v3454_v21 }
 0x4a1   :  { %v1996_v41 = vpop.permute.xlu1 %1995 }
 0x4a5   :  { %v1998_v49 = vpop.permute.xlu0 %1997  ;;  %v1980_v61 = vpop.permute.xlu1 %1979 }
 0x4a6   :  { %v2003_v1 = vsel %vm1064_vm4, %v1996_v41, %v1980_v61  ;;  %v2015_v5 = vsel %vm1064_vm4, %v1980_v61, %v1996_v41 }
 0x4a7   :  { %v2019_v60 = vmul.f32 %v2015_v5, %v3327_v42  ;;  %v2020_v21 = vmul.f32 %v2003_v1, %v3329_v23 }
 0x4a9   :  { %v1982_v47 = vpop.permute.xlu0 %1981  ;;  %v2000_v10 = vpop.permute.xlu1 %1999  ;;  %v2027_v7 = vadd.f32 %v2019_v60, %v1967_v54  ;;  %v2028_v27 = vadd.f32 %v2020_v21, %v1968_v14 }
 0x4aa   :  { %v2016_v18 = vsel %vm1064_vm4, %v1982_v47, %v1998_v49  ;;  %v2004_v8 = vsel %vm1064_vm4, %v1998_v49, %v1982_v47 }
 0x4ab   :  { %v2021_v44 = vmul.f32 %v2016_v18, %v3327_v42  ;;  %v2022_v17 = vmul.f32 %v2004_v8, %v3329_v23 }
 0x4ad   :  { %v2002_v20 = vpop.permute.xlu0 %2001  ;;  %v1984_v38 = vpop.permute.xlu1 %1983  ;;  %v2029_v33 = vadd.f32 %v2021_v44, %v1969_v63  ;;  %v2030_v34 = vadd.f32 %v2022_v17, %v1970_v56 }
 0x4ae   :  { %v2017_v12 = vsel %vm1064_vm4, %v1984_v38, %v2000_v10  ;;  %v2005_v43 = vsel %vm1064_vm4, %v2000_v10, %v1984_v38 }
 0x4af   :  { %v2023_v3 = vmul.f32 %v2017_v12, %v3327_v42  ;;  %v2024_v37 = vmul.f32 %v2005_v43, %v3329_v23 }
 0x4b1   :  { %v1986_v59 = vpop.permute.xlu0 %1985  ;;  %v2031_v39 = vadd.f32 %v2023_v3, %v1971_v48  ;;  %v2032_v9 = vadd.f32 %v2024_v37, %v1972_v35 }
 0x4b2   :  { %v2006_v46 = vsel %vm1064_vm4, %v2002_v20, %v1986_v59  ;;  %v2018_v31 = vsel %vm1064_vm4, %v1986_v59, %v2002_v20 }
 0x4b3   :  { %v2025_v22 = vmul.f32 %v2018_v31, %v3327_v42  ;;  %v2026_v41 = vmul.f32 %v2006_v46, %v3329_v23  ;;  %v1974_v23 = vadd.f32 %v3510_v26, %v3294_v50 }
 0x4b5   :  { %v2033_v1 = vadd.f32 %v2025_v22, %v1973_v4  ;;  %v2034_v60 = vadd.f32 %v2026_v41, %v1974_v23 }
 0x4c1   :  { %v2044_v53 = vpop.permute.xlu1 %2043 }
 0x4c3   :  { %v2046_v36 = vpop.permute.xlu0 %2045 }
 0x4c4   :  { %v2059_v28 = vsel %vm1139_vm5, %v2044_v53, %v2046_v36  ;;  %v2075_v25 = vsel %vm1139_vm5, %v2046_v36, %v2044_v53 }
 0x4c5   :  { %v2079_v15 = vmul.f32 %v2059_v28, %v3341_v51  ;;  %v2080_v30 = vmul.f32 %v2075_v25, %v3347_v57  ;;  %v2048_v32 = vpop.permute.xlu1 %2047 }
 0x4c7   :  { %v2087_v58 = vadd.f32 %v2079_v15, %v2027_v7  ;;  %v2088_v13 = vadd.f32 %v2080_v30, %v2028_v27  ;;  %v2050_v29 = vpop.permute.xlu0 %2049 }
 0x4c8   :  { %v2060_v40 = vsel %vm1139_vm5, %v2048_v32, %v2050_v29  ;;  %v2076_v55 = vsel %vm1139_vm5, %v2050_v29, %v2048_v32 }
 0x4c9   :  { %2276 = vst [vmem:[%s3636_s8 + $0x40] sm:$0xff] %v2087_v58  ;;  %2277 = vst [vmem:[%s3636_s8 + $0x48] sm:$0xff] %v2088_v13  ;;  %v2081_v62 = vmul.f32 %v2060_v40, %v3341_v51  ;;  %v2082_v16 = vmul.f32 %v2076_v55, %v3347_v57  ;;  %v2052_v45 = vpop.permute.xlu1 %2051  ;;  %v2107_v0 = vadd.f32 %v2088_v13, %v2087_v58 }
 0x4ca   :  { %v2123_v2 = vmul.f32 %v2087_v58, %v2087_v58  ;;  %v2124_v19 = vmul.f32 %v2088_v13, %v2088_v13 }
 0x4cb   :  { %v2089_v6 = vadd.f32 %v2081_v62, %v2029_v33  ;;  %v2090_v11 = vadd.f32 %v2082_v16, %v2030_v34  ;;  %2108 = vadd.xlane.f32.xlu0 %v2107_v0  ;;  %v2054_v24 = vpop.permute.xlu0 %2053 }
 0x4cc   :  { %v2061_v49 = vsel %vm1139_vm5, %v2052_v45, %v2054_v24  ;;  %v2077_v61 = vsel %vm1139_vm5, %v2054_v24, %v2052_v45  ;;  %v2131_v47 = vadd.f32 %v2124_v19, %v2123_v2 }
 0x4cd   :  { %2278 = vst [vmem:[%s3636_s8 + $0x50] sm:$0xff] %v2089_v6  ;;  %2279 = vst [vmem:[%s3636_s8 + $0x58] sm:$0xff] %v2090_v11  ;;  %v2083_v42 = vmul.f32 %v2061_v49, %v3341_v51  ;;  %v2084_v52 = vmul.f32 %v2077_v61, %v3347_v57  ;;  %v2110_v10 = vadd.f32 %v2090_v11, %v2089_v6  ;;  %v2056_v59 = vpop.permute.xlu1 %2055 }
 0x4ce   :  { %v2125_v20 = vmul.f32 %v2089_v6, %v2089_v6  ;;  %v2126_v38 = vmul.f32 %v2090_v11, %v2090_v11 }
 0x4cf   :  { %v2091_v5 = vadd.f32 %v2083_v42, %v2031_v39  ;;  %v2092_v18 = vadd.f32 %v2084_v52, %v2032_v9  ;;  %2132 = vadd.xlane.f32.xlu0 %v2131_v47  ;;  %2111 = vadd.xlane.f32.xlu1 %v2110_v10  ;;  %v2058_v8 = vpop.permute.xlu0 %2057 }
 0x4d0   :  { %v2062_v21 = vsel %vm1139_vm5, %v2056_v59, %v2058_v8  ;;  %v2078_v53 = vsel %vm1139_vm5, %v2058_v8, %v2056_v59  ;;  %v2134_v54 = vadd.f32 %v2126_v38, %v2125_v20 }
 0x4d1   :  { %2280 = vst [vmem:[%s3636_s8 + $0x60] sm:$0xff] %v2091_v5  ;;  %2281 = vst [vmem:[%s3636_s8 + $0x68] sm:$0xff] %v2092_v18  ;;  %v2085_v50 = vmul.f32 %v2062_v21, %v3341_v51  ;;  %v2086_v26 = vmul.f32 %v2078_v53, %v3347_v57  ;;  %v2113_v44 = vadd.f32 %v2092_v18, %v2091_v5 }
 0x4d2   :  { %v2127_v14 = vmul.f32 %v2091_v5, %v2091_v5  ;;  %v2128_v63 = vmul.f32 %v2092_v18, %v2092_v18 }
 0x4d3   :  { %v2093_v17 = vadd.f32 %v2085_v50, %v2033_v1  ;;  %v2094_v12 = vadd.f32 %v2086_v26, %v2034_v60  ;;  %2135 = vadd.xlane.f32.xlu1 %v2134_v54  ;;  %2114 = vadd.xlane.f32.xlu0 %v2113_v44 }
 0x4d4   :  { %v2137_v36 = vadd.f32 %v2128_v63, %v2127_v14 }
 0x4d5   :  { %2282 = vst [vmem:[%s3636_s8 + $0x70] sm:$0xff] %v2093_v17  ;;  %2283 = vst [vmem:[%s3636_s8 + $0x78] sm:$0xff] %v2094_v12  ;;  %v2116_v56 = vadd.f32 %v2094_v12, %v2093_v17  ;;  %v2129_v51 = vmul.f32 %v2093_v17, %v2093_v17  ;;  %v2130_v43 = vmul.f32 %v2094_v12, %v2094_v12 }
 0x4d7   :  { %2138 = vadd.xlane.f32.xlu0 %v2137_v36  ;;  %2117 = vadd.xlane.f32.xlu1 %v2116_v56  ;;  %v2140_v57 = vadd.f32 %v2130_v43, %v2129_v51 }
 0x4db   :  { %2141 = vadd.xlane.f32.xlu1 %v2140_v57 }
 0x505   :  { %v1209_v28 = vpop.xlane.xlu0 %1208 }
 0x508   :  { %v1206_v25 = vpop.xlane.xlu1 %1205 }
 0x509   :  { %v1212_v7 = vpop.xlane.xlu0 %1211 }
 0x50c   :  { %v1215_v27 = vpop.xlane.xlu1 %1214 }
 0x50d   :  { %v1230_v15 = vpop.xlane.xlu0 %1229 }
 0x510   :  { %v1233_v30 = vpop.xlane.xlu1 %1232 }
 0x511   :  { %v1236_v32 = vpop.xlane.xlu0 %1235 }
 0x514   :  { %v1239_v48 = vpop.xlane.xlu1 %1238 }
 0x554   :  { %v2109_v35 = vpop.xlane.xlu0 %2108 }
 0x555   :  { %v2119_v34 = vadd.f32 %v2109_v35, %v1206_v25 }
 0x558   :  { %v2112_v33 = vpop.xlane.xlu1 %2111  ;;  %v2133_v3 = vpop.xlane.xlu0 %2132 }
 0x559   :  { %v2143_v37 = vadd.f32 %v2133_v3, %v1230_v15  ;;  %v2120_v46 = vadd.f32 %v2112_v33, %v1209_v28 }
 0x55b   :  { %v2147_v58 = vsel %vm358_vm2, %v2119_v34, %v2143_v37 }
 0x55c   :  { %2152 = vst.msk [vmem:[%s3637_s10] sm:$0xff] %vm2151_vm6, %v2147_v58  ;;  %v2136_v13 = vpop.xlane.xlu1 %2135  ;;  %v2115_v29 = vpop.xlane.xlu0 %2114 }
 0x55d   :  { %v2144_v31 = vadd.f32 %v2136_v13, %v1233_v30  ;;  %v2121_v16 = vadd.f32 %v2115_v29, %v1212_v7 }
 0x55f   :  { %v2148_v40 = vsel %vm358_vm2, %v2120_v46, %v2144_v31 }
 0x560   :  { %2153 = vst.msk [vmem:[%s3637_s10 + $0x8] sm:$0xff] %vm2151_vm6, %v2148_v40  ;;  %v2118_v55 = vpop.xlane.xlu1 %2117  ;;  %v2139_v62 = vpop.xlane.xlu0 %2138 }
 0x561   :  { %v2145_v45 = vadd.f32 %v2139_v62, %v1236_v32  ;;  %v2122_v4 = vadd.f32 %v2118_v55, %v1215_v27 }
 0x563   :  { %v2149_v0 = vsel %vm358_vm2, %v2121_v16, %v2145_v45 }
 0x564   :  { %2154 = vst.msk [vmem:[%s3637_s10 + $0x10] sm:$0xff] %vm2151_vm6, %v2149_v0  ;;  %v2142_v2 = vpop.xlane.xlu1 %2141 }
 0x565   :  { %v2146_v39 = vadd.f32 %v2142_v2, %v1239_v48 }
 0x567   :  { %v2150_v19 = vsel %vm358_vm2, %v2122_v4, %v2146_v39 }
 0x568   :  { %2155 = vst.msk [vmem:[%s3637_s10 + $0x18] sm:$0xff] %vm2151_vm6, %v2150_v19 }

</bundles_post_ra>
